<compile_context>
chip_gen: v5e
topology: v5e:2x2
jax: 0.10.0
libtpu: 0.0.40
codegen_flags: <defaults>
</compile_context>

<pallas_src>
import jax
import jax.numpy as jnp
from jax.experimental import pallas as pl
from jax.experimental.pallas import tpu as pltpu

LANE = 128
SUBLANE_I8 = 32          # int8 sublane tiling -> batch tiles aligned to 32


def _round_up(n, m):
    return (n + m - 1) // m * m


def _num_tensorcores():
    """Best-effort TensorCores-per-chip (2 on v7x, 1 on v5e/v6e)."""
    try:
        info = pltpu.get_tpu_info()
        for attr in ("num_cores", "num_tensorcores", "tensor_cores_per_chip",
                     "cores_per_chip", "num_tensor_cores"):
            n = getattr(info, attr, None)
            if isinstance(n, int) and 1 <= n <= 8:
                return n
    except Exception:
        pass
    try:
        if "v7" in jax.devices()[0].device_kind.lower():
            return 2
    except Exception:
        pass
    return 1


# --------------------------------------------------------------------------- #
# Kernel
# --------------------------------------------------------------------------- #
def actor_kernel(x_ref, mask_ref,
                 w1_ref, b1_ref, w2_ref, b2_ref,
                 w3_ref, b3_ref, w4_ref, b4_ref,
                 out_ref):
    # fc1 -> relu   (bf16 MXU matmuls, f32 accumulate / elementwise epilogue)
    x = x_ref[...].astype(jnp.bfloat16)
    h = jnp.dot(x, w1_ref[...], preferred_element_type=jnp.float32) + b1_ref[...]
    h = jnp.maximum(h, 0.0)
    # fc2 -> relu
    h = jnp.dot(h.astype(jnp.bfloat16), w2_ref[...],
                preferred_element_type=jnp.float32) + b2_ref[...]
    h = jnp.maximum(h, 0.0)
    # fc3 -> relu
    h = jnp.dot(h.astype(jnp.bfloat16), w3_ref[...],
                preferred_element_type=jnp.float32) + b3_ref[...]
    h = jnp.maximum(h, 0.0)
    # action_head
    logits = jnp.dot(h.astype(jnp.bfloat16), w4_ref[...],
                     preferred_element_type=jnp.float32) + b4_ref[...]
    # x[mask == False] = -inf  (large negative constant so fully-masked /
    # batch-padding rows stay finite; exp underflows to exactly 0)
    keep = mask_ref[...] != 0
    logits = jnp.where(keep, logits, jnp.float32(-1e30))
    # softmax over dim=1 — exact divide so each row sums to exactly 1
    # (probabilities feed PPO log-prob ratios; divide is off the critical path).
    m = jnp.max(logits, axis=1, keepdims=True)
    e = jnp.exp(logits - m)
    s = jnp.sum(e, axis=1, keepdims=True)
    out_ref[...] = e / s


# --------------------------------------------------------------------------- #
# One-time parameter / mask preparation
# --------------------------------------------------------------------------- #
def prepare_params(params, num_output):
    """Zero-pad feature dims to multiples of 128 and cast W's to bf16 (once).

    Zero padding preserves the math: padded hidden units have zero weights and
    zero bias -> relu(0) = 0 and contribute nothing downstream; padded output
    columns are masked off (mask = 0) and sliced away by the wrapper.
    d_in is deliberately NOT padded and targets stay 128 (not 256): the kernel
    is overhead-bound, extra padding only costs DMA/VMEM.
    """
    def pad_w(w, rows, cols):
        return jnp.zeros((rows, cols), jnp.float32).at[:w.shape[0], :w.shape[1]].set(w)

    def pad_b(b, cols):
        return jnp.zeros((1, cols), jnp.float32).at[:, :b.shape[1]].set(b)

    d_in = params["w1"].shape[0]
    d1 = _round_up(params["w1"].shape[1], LANE)
    d2 = _round_up(params["w2"].shape[1], LANE)
    d3 = _round_up(params["w3"].shape[1], LANE)
    d4 = _round_up(num_output, LANE)
    return {
        "w1": pad_w(params["w1"], d_in, d1).astype(jnp.bfloat16),
        "b1": pad_b(params["b1"], d1),
        "w2": pad_w(params["w2"], d1, d2).astype(jnp.bfloat16),
        "b2": pad_b(params["b2"], d2),
        "w3": pad_w(params["w3"], d2, d3).astype(jnp.bfloat16),
        "b3": pad_b(params["b3"], d3),
        "w4": pad_w(params["w4"], d3, d4).astype(jnp.bfloat16),
        "b4": pad_b(params["b4"], d4),
    }


def prepare_mask(mask, d_out):
    """bool/int (B, num_output) -> int8 (B, d_out), zero-padded columns.

    Do this once per env / rollout (shape-static), not per forward call, so the
    forward path emits no extra HBM-materializing ops for the mask.
    """
    m = mask.astype(jnp.int8)
    pad_cols = d_out - m.shape[1]
    if pad_cols > 0:
        m = jnp.pad(m, ((0, 0), (0, pad_cols)))
    return m


# --------------------------------------------------------------------------- #
# Wrapper
# --------------------------------------------------------------------------- #
def actor_forward(x, mask_i8, padded_params, num_output, *, tile_b=256,
                  slice_output=True, single_buffer_weights=True):
    """x: (B, num_input) f32, mask_i8: prepared int8 (B, d_out) (or raw bool
    mask, slow path) -> (B, num_output) f32 action probabilities."""
    B, d_in = x.shape
    w1, b1 = padded_params["w1"], padded_params["b1"]
    w2, b2 = padded_params["w2"], padded_params["b2"]
    w3, b3 = padded_params["w3"], padded_params["b3"]
    w4, b4 = padded_params["w4"], padded_params["b4"]
    d1, d2, d3, d_out = w1.shape[1], w2.shape[1], w3.shape[1], w4.shape[1]

    # Slow path for callers that pass the raw (B, num_output) bool mask.
    if mask_i8.shape[1] != d_out or mask_i8.dtype != jnp.int8:
        mask_i8 = prepare_mask(mask_i8, d_out)

    # ---- batch tiling -------------------------------------------------------
    num_tc = _num_tensorcores()
    tile_b = _round_up(max(int(tile_b), SUBLANE_I8), SUBLANE_I8)
    b_ceil = _round_up(B, SUBLANE_I8)
    if num_tc > 1:
        # v7x: guarantee >= 1 tile per TensorCore so ("parallel",) grid sharding
        # actually uses both cores.
        tile_b = min(tile_b,
                     max(SUBLANE_I8, _round_up(pl.cdiv(b_ceil, num_tc), SUBLANE_I8)))
    tile_b = min(tile_b, b_ceil)
    b_pad = _round_up(B, tile_b)
    grid = (b_pad // tile_b,)

    # Batch padding only when actually needed (common case: b_pad == B).
    if b_pad != B:
        x = jnp.pad(x, ((0, b_pad - B), (0, 0)))
        mask_i8 = jnp.pad(mask_i8, ((0, b_pad - B), (0, 0)))

    # ---- explicit VMEM budget (v5e default scoped limit is only 16 MiB) -----
    weight_bytes = (2 * (w1.size + w2.size + w3.size + w4.size) * 2    # bf16, x2 headroom
                    + 2 * (b1.size + b2.size + b3.size + b4.size) * 4)
    io_bytes = 2 * tile_b * (d_in * 4 + d_out * 1 + d_out * 4)          # dbl-buf x/mask/out
    scratch_bytes = 6 * tile_b * max(d1, d2, d3, d_out) * 4             # f32 intermediates
    vmem_limit = int(min(weight_bytes + io_bytes + scratch_bytes + (8 << 20), 64 << 20))

    flops = 2 * b_pad * (d_in * d1 + d1 * d2 + d2 * d3 + d3 * d_out)
    transcendentals = b_pad * d_out                                     # exp
    bytes_accessed = (b_pad * d_in * 4 + b_pad * d_out * 1 +            # x, mask
                      (d_in * d1 + d1 * d2 + d2 * d3 + d3 * d_out) * 2 +
                      (d1 + d2 + d3 + d_out) * 4 +
                      b_pad * d_out * 4)                                # output

    def _weight_spec(shape, single_buffer):
        # Constant index_map => weights stay VMEM-resident across grid steps.
        # Buffered(1) drops the default double-buffer (halves resident VMEM).
        if single_buffer and hasattr(pl, "Buffered"):
            return pl.BlockSpec(shape, lambda i: (0, 0),
                                pipeline_mode=pl.Buffered(1))
        return pl.BlockSpec(shape, lambda i: (0, 0))

    def _call(single_buffer):
        return pl.pallas_call(
            actor_kernel,
            out_shape=jax.ShapeDtypeStruct((b_pad, d_out), jnp.float32),
            grid=grid,
            in_specs=[
                pl.BlockSpec((tile_b, d_in), lambda i: (i, 0)),    # x    (batch-tiled)
                pl.BlockSpec((tile_b, d_out), lambda i: (i, 0)),   # mask (batch-tiled)
                _weight_spec(w1.shape, single_buffer),
                _weight_spec(b1.shape, single_buffer),
                _weight_spec(w2.shape, single_buffer),
                _weight_spec(b2.shape, single_buffer),
                _weight_spec(w3.shape, single_buffer),
                _weight_spec(b3.shape, single_buffer),
                _weight_spec(w4.shape, single_buffer),
                _weight_spec(b4.shape, single_buffer),
            ],
            out_specs=pl.BlockSpec((tile_b, d_out), lambda i: (i, 0)),  # lane-dense store
            compiler_params=pltpu.CompilerParams(
                dimension_semantics=("parallel",),                 # megacore on v7x
                vmem_limit_bytes=vmem_limit),
            cost_estimate=pl.CostEstimate(
                flops=int(flops),
                transcendentals=int(transcendentals),
                bytes_accessed=int(bytes_accessed)),
        )(x, mask_i8, w1, b1, w2, b2, w3, b3, w4, b4)

    if single_buffer_weights:
        try:
            out = _call(True)
        except Exception:
            # Older runtime without pipeline_mode / Buffered(1) support.
            out = _call(False)
    else:
        out = _call(False)

    if slice_output:
        # Extra HBM copy; skip with slice_output=False if the consumer accepts
        # the lane-dense (b_pad, 128) buffer (padded columns of real rows are 0).
        return out[:B, :num_output]
    return out


# --------------------------------------------------------------------------- #
# Reference + synthetic init
# --------------------------------------------------------------------------- #
def init_params(key, num_input, num_output, node_num):
    """Deterministic synthetic init (Linear weights stored transposed:
    (in_features, out_features))."""
    dims = [(num_input, node_num), (node_num, node_num),
            (node_num, 100), (100, num_output)]
    params = {}
    keys = jax.random.split(key, 2 * len(dims))
    for i, (fan_in, fan_out) in enumerate(dims):
        scale = 1.0 / jnp.sqrt(jnp.float32(fan_in))
        params[f"w{i+1}"] = jax.random.normal(
            keys[2 * i], (fan_in, fan_out), jnp.float32) * scale
        params[f"b{i+1}"] = jax.random.normal(
            keys[2 * i + 1], (1, fan_out), jnp.float32) * scale
    return params


def actor_reference(x, mask, params):
    """Plain-XLA reference using the same numerics as the kernel (bf16 weights
    and activations into the MXU, f32 accumulate, exact softmax) so the
    comparison isolates kernel correctness at ~1e-3 tolerance."""
    def mm(a, w):
        return jnp.dot(a.astype(jnp.bfloat16), w.astype(jnp.bfloat16),
                       preferred_element_type=jnp.float32)
    h = jax.nn.relu(mm(x, params["w1"]) + params["b1"])
    h = jax.nn.relu(mm(h, params["w2"]) + params["b2"])
    h = jax.nn.relu(mm(h, params["w3"]) + params["b3"])
    logits = mm(h, params["w4"]) + params["b4"]
    logits = jnp.where(mask, logits, -jnp.inf)
    return jax.nn.softmax(logits, axis=1)


if __name__ == "__main__":
    num_input, node_num, num_output = 32, 128, 16
    key = jax.random.PRNGKey(0)
    k_par, k_x, k_mask, k_x2, k_mask2 = jax.random.split(key, 5)

    params = init_params(k_par, num_input, num_output, node_num)
    padded = prepare_params(params, num_output)
    d_out = padded["w4"].shape[1]

    # ---- case 1: 32-aligned batch, default tile (no wrapper-side padding) ----
    B = 128
    x = jax.random.normal(k_x, (B, num_input), jnp.float32)
    mask = jax.random.bernoulli(k_mask, 0.6, (B, num_output)).at[:, 0].set(True)
    mask_i8 = prepare_mask(mask, d_out)          # prepared once, reused per forward

    out = actor_forward(x, mask_i8, padded, num_output)
    out = jax.block_until_ready(out)
    ref = actor_reference(x, mask, params)

    assert out.shape == (B, num_output)
    assert bool(jnp.all(jnp.isfinite(out)))
    # exact divide => rows sum to 1 (PPO log-prob ratios stay unbiased)
    assert bool(jnp.allclose(jnp.sum(out, axis=1), 1.0, atol=1e-5))
    assert bool(jnp.allclose(out, ref, atol=1e-3, rtol=1e-3)), \
        float(jnp.max(jnp.abs(out - ref)))

    # ---- case 2: ragged batch (row padding) + multi-step batch grid ----------
    B2 = 50
    x2 = jax.random.normal(k_x2, (B2, num_input), jnp.float32)
    mask2 = jax.random.bernoulli(k_mask2, 0.6, (B2, num_output)).at[:, 0].set(True)
    out2 = actor_forward(x2, prepare_mask(mask2, d_out), padded, num_output,
                         tile_b=32)
    out2 = jax.block_until_ready(out2)
    ref2 = actor_reference(x2, mask2, params)
    assert out2.shape == (B2, num_output)
    assert bool(jnp.allclose(out2, ref2, atol=1e-3, rtol=1e-3)), \
        float(jnp.max(jnp.abs(out2 - ref2)))

    print("KERNEL_OK")
</pallas_src>

<mosaic_0001>
module attributes {stable_mosaic.version = 11 : i64} {
  func.func @actor_kernel(%arg0: i32, %arg1: memref<128x32xf32, #tpu.memory_space<vmem>>, %arg2: memref<128x128xi8, #tpu.memory_space<vmem>>, %arg3: memref<32x128xbf16, #tpu.memory_space<vmem>>, %arg4: memref<1x128xf32, #tpu.memory_space<vmem>>, %arg5: memref<128x128xbf16, #tpu.memory_space<vmem>>, %arg6: memref<1x128xf32, #tpu.memory_space<vmem>>, %arg7: memref<128x128xbf16, #tpu.memory_space<vmem>>, %arg8: memref<1x128xf32, #tpu.memory_space<vmem>>, %arg9: memref<128x128xbf16, #tpu.memory_space<vmem>>, %arg10: memref<1x128xf32, #tpu.memory_space<vmem>>, %arg11: memref<128x128xf32, #tpu.memory_space<vmem>>) attributes {dimension_semantics = [#tpu.dimension_semantics<parallel>], iteration_bounds = array<i64: 1>, scalar_prefetch = 0 : i64, scratch_operands = 0 : i64, tpu.core_type = #tpu.core_type<tc>, window_params = [{transform_indices = @transform_0, window_bounds = array<i64: 128, 32>}, {transform_indices = @transform_1, window_bounds = array<i64: 128, 128>}, {pipeline_mode = #tpu.pipeline_mode<synchronous>, transform_indices = @transform_2, window_bounds = array<i64: 32, 128>}, {pipeline_mode = #tpu.pipeline_mode<synchronous>, transform_indices = @transform_3, window_bounds = array<i64: 1, 128>}, {pipeline_mode = #tpu.pipeline_mode<synchronous>, transform_indices = @transform_4, window_bounds = array<i64: 128, 128>}, {pipeline_mode = #tpu.pipeline_mode<synchronous>, transform_indices = @transform_5, window_bounds = array<i64: 1, 128>}, {pipeline_mode = #tpu.pipeline_mode<synchronous>, transform_indices = @transform_6, window_bounds = array<i64: 128, 128>}, {pipeline_mode = #tpu.pipeline_mode<synchronous>, transform_indices = @transform_7, window_bounds = array<i64: 1, 128>}, {pipeline_mode = #tpu.pipeline_mode<synchronous>, transform_indices = @transform_8, window_bounds = array<i64: 128, 128>}, {pipeline_mode = #tpu.pipeline_mode<synchronous>, transform_indices = @transform_9, window_bounds = array<i64: 1, 128>}, {transform_indices = @transform_10, window_bounds = array<i64: 128, 128>}]} {
    %c0 = arith.constant 0 : index
    %c0_0 = arith.constant 0 : index
    %0 = vector.load %arg1[%c0, %c0_0] : memref<128x32xf32, #tpu.memory_space<vmem>>, vector<128x32xf32>
    %1 = arith.truncf %0 : vector<128x32xf32> to vector<128x32xbf16>
    %c0_1 = arith.constant 0 : index
    %c0_2 = arith.constant 0 : index
    %2 = vector.load %arg3[%c0_1, %c0_2] : memref<32x128xbf16, #tpu.memory_space<vmem>>, vector<32x128xbf16>
    %cst = arith.constant dense<0.000000e+00> : vector<128x128xf32>
    %3 = tpu.matmul %1, %2, %cst {dimension_numbers = #tpu.dot_dimension_numbers<[1], [0], [0], [1], [0, 0, 1, 1], [], []>} : vector<128x32xbf16>, vector<32x128xbf16>, vector<128x128xf32> -> vector<128x128xf32>
    %c0_3 = arith.constant 0 : index
    %c0_4 = arith.constant 0 : index
    %4 = vector.load %arg4[%c0_3, %c0_4] : memref<1x128xf32, #tpu.memory_space<vmem>>, vector<1x128xf32>
    %5 = vector.broadcast %4 : vector<1x128xf32> to vector<128x128xf32>
    %6 = arith.addf %3, %5 : vector<128x128xf32>
    %cst_5 = arith.constant 0.000000e+00 : f32
    %7 = vector.broadcast %cst_5 : f32 to vector<128x128xf32>
    %8 = arith.maximumf %6, %7 : vector<128x128xf32>
    %9 = arith.truncf %8 : vector<128x128xf32> to vector<128x128xbf16>
    %c0_6 = arith.constant 0 : index
    %c0_7 = arith.constant 0 : index
    %10 = vector.load %arg5[%c0_6, %c0_7] : memref<128x128xbf16, #tpu.memory_space<vmem>>, vector<128x128xbf16>
    %cst_8 = arith.constant dense<0.000000e+00> : vector<128x128xf32>
    %11 = tpu.matmul %9, %10, %cst_8 {dimension_numbers = #tpu.dot_dimension_numbers<[1], [0], [0], [1], [0, 0, 1, 1], [], []>} : vector<128x128xbf16>, vector<128x128xbf16>, vector<128x128xf32> -> vector<128x128xf32>
    %c0_9 = arith.constant 0 : index
    %c0_10 = arith.constant 0 : index
    %12 = vector.load %arg6[%c0_9, %c0_10] : memref<1x128xf32, #tpu.memory_space<vmem>>, vector<1x128xf32>
    %13 = vector.broadcast %12 : vector<1x128xf32> to vector<128x128xf32>
    %14 = arith.addf %11, %13 : vector<128x128xf32>
    %cst_11 = arith.constant 0.000000e+00 : f32
    %15 = vector.broadcast %cst_11 : f32 to vector<128x128xf32>
    %16 = arith.maximumf %14, %15 : vector<128x128xf32>
    %17 = arith.truncf %16 : vector<128x128xf32> to vector<128x128xbf16>
    %c0_12 = arith.constant 0 : index
    %c0_13 = arith.constant 0 : index
    %18 = vector.load %arg7[%c0_12, %c0_13] : memref<128x128xbf16, #tpu.memory_space<vmem>>, vector<128x128xbf16>
    %cst_14 = arith.constant dense<0.000000e+00> : vector<128x128xf32>
    %19 = tpu.matmul %17, %18, %cst_14 {dimension_numbers = #tpu.dot_dimension_numbers<[1], [0], [0], [1], [0, 0, 1, 1], [], []>} : vector<128x128xbf16>, vector<128x128xbf16>, vector<128x128xf32> -> vector<128x128xf32>
    %c0_15 = arith.constant 0 : index
    %c0_16 = arith.constant 0 : index
    %20 = vector.load %arg8[%c0_15, %c0_16] : memref<1x128xf32, #tpu.memory_space<vmem>>, vector<1x128xf32>
    %21 = vector.broadcast %20 : vector<1x128xf32> to vector<128x128xf32>
    %22 = arith.addf %19, %21 : vector<128x128xf32>
    %cst_17 = arith.constant 0.000000e+00 : f32
    %23 = vector.broadcast %cst_17 : f32 to vector<128x128xf32>
    %24 = arith.maximumf %22, %23 : vector<128x128xf32>
    %25 = arith.truncf %24 : vector<128x128xf32> to vector<128x128xbf16>
    %c0_18 = arith.constant 0 : index
    %c0_19 = arith.constant 0 : index
    %26 = vector.load %arg9[%c0_18, %c0_19] : memref<128x128xbf16, #tpu.memory_space<vmem>>, vector<128x128xbf16>
    %cst_20 = arith.constant dense<0.000000e+00> : vector<128x128xf32>
    %27 = tpu.matmul %25, %26, %cst_20 {dimension_numbers = #tpu.dot_dimension_numbers<[1], [0], [0], [1], [0, 0, 1, 1], [], []>} : vector<128x128xbf16>, vector<128x128xbf16>, vector<128x128xf32> -> vector<128x128xf32>
    %c0_21 = arith.constant 0 : index
    %c0_22 = arith.constant 0 : index
    %28 = vector.load %arg10[%c0_21, %c0_22] : memref<1x128xf32, #tpu.memory_space<vmem>>, vector<1x128xf32>
    %29 = vector.broadcast %28 : vector<1x128xf32> to vector<128x128xf32>
    %30 = arith.addf %27, %29 : vector<128x128xf32>
    %c0_23 = arith.constant 0 : index
    %c0_24 = arith.constant 0 : index
    %31 = vector.load %arg2[%c0_23, %c0_24] : memref<128x128xi8, #tpu.memory_space<vmem>>, vector<128x128xi8>
    %c0_i8 = arith.constant 0 : i8
    %32 = vector.broadcast %c0_i8 : i8 to vector<128x128xi8>
    %33 = arith.cmpi ne, %31, %32 : vector<128x128xi8>
    %cst_25 = arith.constant -1.000000e+30 : f32
    %34 = vector.broadcast %cst_25 : f32 to vector<128x128xf32>
    %35 = arith.select %33, %30, %34 : vector<128x128xi1>, vector<128x128xf32>
    %cst_26 = arith.constant dense<0xFF800000> : vector<128xf32>
    %36 = vector.multi_reduction <maximumf>, %35, %cst_26 [1] : vector<128x128xf32> to vector<128xf32>
    %37 = vector.shape_cast %36 : vector<128xf32> to vector<128x1xf32>
    %38 = vector.broadcast %37 : vector<128x1xf32> to vector<128x128xf32>
    %39 = arith.subf %35, %38 : vector<128x128xf32>
    %40 = math.exp %39 : vector<128x128xf32>
    %cst_27 = arith.constant dense<0.000000e+00> : vector<128xf32>
    %41 = vector.multi_reduction <add>, %40, %cst_27 [1] : vector<128x128xf32> to vector<128xf32>
    %42 = vector.shape_cast %41 : vector<128xf32> to vector<128x1xf32>
    %43 = vector.broadcast %42 : vector<128x1xf32> to vector<128x128xf32>
    %44 = arith.divf %40, %43 : vector<128x128xf32>
    %c0_28 = arith.constant 0 : index
    %c0_29 = arith.constant 0 : index
    %45 = vector.load %arg11[%c0_28, %c0_29] : memref<128x128xf32, #tpu.memory_space<vmem>>, vector<128x128xf32>
    tpu.vector_store %arg11[%c0_28, %c0_29], %44 {strides = array<i32>} : memref<128x128xf32, #tpu.memory_space<vmem>>, vector<128x128xf32>,
    return
  }
  func.func @transform_0(%arg0: i32) -> (i32, i32) {
    %c0_i32 = arith.constant 0 : i32
    %c0_i32_0 = arith.constant 0 : i32
    return %arg0, %c0_i32 : i32, i32
  }
  func.func @transform_1(%arg0: i32) -> (i32, i32) {
    %c0_i32 = arith.constant 0 : i32
    %c0_i32_0 = arith.constant 0 : i32
    return %arg0, %c0_i32 : i32, i32
  }
  func.func @transform_2(%arg0: i32) -> (i32, i32) {
    %c0_i32 = arith.constant 0 : i32
    %c0_i32_0 = arith.constant 0 : i32
    %c0_i32_1 = arith.constant 0 : i32
    return %c0_i32, %c0_i32_0 : i32, i32
  }
  func.func @transform_3(%arg0: i32) -> (i32, i32) {
    %c0_i32 = arith.constant 0 : i32
    %c0_i32_0 = arith.constant 0 : i32
    %c0_i32_1 = arith.constant 0 : i32
    return %c0_i32, %c0_i32_0 : i32, i32
  }
  func.func @transform_4(%arg0: i32) -> (i32, i32) {
    %c0_i32 = arith.constant 0 : i32
    %c0_i32_0 = arith.constant 0 : i32
    %c0_i32_1 = arith.constant 0 : i32
    return %c0_i32, %c0_i32_0 : i32, i32
  }
  func.func @transform_5(%arg0: i32) -> (i32, i32) {
    %c0_i32 = arith.constant 0 : i32
    %c0_i32_0 = arith.constant 0 : i32
    %c0_i32_1 = arith.constant 0 : i32
    return %c0_i32, %c0_i32_0 : i32, i32
  }
  func.func @transform_6(%arg0: i32) -> (i32, i32) {
    %c0_i32 = arith.constant 0 : i32
    %c0_i32_0 = arith.constant 0 : i32
    %c0_i32_1 = arith.constant 0 : i32
    return %c0_i32, %c0_i32_0 : i32, i32
  }
  func.func @transform_7(%arg0: i32) -> (i32, i32) {
    %c0_i32 = arith.constant 0 : i32
    %c0_i32_0 = arith.constant 0 : i32
    %c0_i32_1 = arith.constant 0 : i32
    return %c0_i32, %c0_i32_0 : i32, i32
  }
  func.func @transform_8(%arg0: i32) -> (i32, i32) {
    %c0_i32 = arith.constant 0 : i32
    %c0_i32_0 = arith.constant 0 : i32
    %c0_i32_1 = arith.constant 0 : i32
    return %c0_i32, %c0_i32_0 : i32, i32
  }
  func.func @transform_9(%arg0: i32) -> (i32, i32) {
    %c0_i32 = arith.constant 0 : i32
    %c0_i32_0 = arith.constant 0 : i32
    %c0_i32_1 = arith.constant 0 : i32
    return %c0_i32, %c0_i32_0 : i32, i32
  }
  func.func @transform_10(%arg0: i32) -> (i32, i32) {
    %c0_i32 = arith.constant 0 : i32
    %c0_i32_0 = arith.constant 0 : i32
    return %arg0, %c0_i32 : i32, i32
  }
}

module attributes {stable_mosaic.version = 11 : i64} {
  func.func @actor_kernel(%arg0: i32, %arg1: memref<128x32xf32, #tpu.memory_space<vmem>>, %arg2: memref<128x128xi8, #tpu.memory_space<vmem>>, %arg3: memref<32x128xbf16, #tpu.memory_space<vmem>>, %arg4: memref<1x128xf32, #tpu.memory_space<vmem>>, %arg5: memref<128x128xbf16, #tpu.memory_space<vmem>>, %arg6: memref<1x128xf32, #tpu.memory_space<vmem>>, %arg7: memref<128x128xbf16, #tpu.memory_space<vmem>>, %arg8: memref<1x128xf32, #tpu.memory_space<vmem>>, %arg9: memref<128x128xbf16, #tpu.memory_space<vmem>>, %arg10: memref<1x128xf32, #tpu.memory_space<vmem>>, %arg11: memref<128x128xf32, #tpu.memory_space<vmem>>) attributes {dimension_semantics = [#tpu.dimension_semantics<parallel>], iteration_bounds = array<i64: 1>, scalar_prefetch = 0 : i64, scratch_operands = 0 : i64, tpu.core_type = #tpu.core_type<tc>, window_params = [{transform_indices = @transform_0, window_bounds = array<i64: 128, 32>}, {transform_indices = @transform_1, window_bounds = array<i64: 128, 128>}, {pipeline_mode = #tpu.pipeline_mode<synchronous>, transform_indices = @transform_2, window_bounds = array<i64: 32, 128>}, {pipeline_mode = #tpu.pipeline_mode<synchronous>, transform_indices = @transform_3, window_bounds = array<i64: 1, 128>}, {pipeline_mode = #tpu.pipeline_mode<synchronous>, transform_indices = @transform_4, window_bounds = array<i64: 128, 128>}, {pipeline_mode = #tpu.pipeline_mode<synchronous>, transform_indices = @transform_5, window_bounds = array<i64: 1, 128>}, {pipeline_mode = #tpu.pipeline_mode<synchronous>, transform_indices = @transform_6, window_bounds = array<i64: 128, 128>}, {pipeline_mode = #tpu.pipeline_mode<synchronous>, transform_indices = @transform_7, window_bounds = array<i64: 1, 128>}, {pipeline_mode = #tpu.pipeline_mode<synchronous>, transform_indices = @transform_8, window_bounds = array<i64: 128, 128>}, {pipeline_mode = #tpu.pipeline_mode<synchronous>, transform_indices = @transform_9, window_bounds = array<i64: 1, 128>}, {transform_indices = @transform_10, window_bounds = array<i64: 128, 128>}]} {
    %c0 = arith.constant 0 : index
    %c0_0 = arith.constant 0 : index
    %0 = vector.load %arg1[%c0, %c0_0] : memref<128x32xf32, #tpu.memory_space<vmem>>, vector<128x32xf32>
    %1 = arith.truncf %0 : vector<128x32xf32> to vector<128x32xbf16>
    %c0_1 = arith.constant 0 : index
    %c0_2 = arith.constant 0 : index
    %2 = vector.load %arg3[%c0_1, %c0_2] : memref<32x128xbf16, #tpu.memory_space<vmem>>, vector<32x128xbf16>
    %cst = arith.constant dense<0.000000e+00> : vector<128x128xf32>
    %3 = tpu.matmul %1, %2, %cst {dimension_numbers = #tpu.dot_dimension_numbers<[1], [0], [0], [1], [0, 0, 1, 1], [], []>} : vector<128x32xbf16>, vector<32x128xbf16>, vector<128x128xf32> -> vector<128x128xf32>
    %c0_3 = arith.constant 0 : index
    %c0_4 = arith.constant 0 : index
    %4 = vector.load %arg4[%c0_3, %c0_4] : memref<1x128xf32, #tpu.memory_space<vmem>>, vector<1x128xf32>
    %5 = vector.broadcast %4 : vector<1x128xf32> to vector<128x128xf32>
    %6 = arith.addf %3, %5 : vector<128x128xf32>
    %cst_5 = arith.constant 0.000000e+00 : f32
    %7 = vector.broadcast %cst_5 : f32 to vector<128x128xf32>
    %8 = arith.maximumf %6, %7 : vector<128x128xf32>
    %9 = arith.truncf %8 : vector<128x128xf32> to vector<128x128xbf16>
    %c0_6 = arith.constant 0 : index
    %c0_7 = arith.constant 0 : index
    %10 = vector.load %arg5[%c0_6, %c0_7] : memref<128x128xbf16, #tpu.memory_space<vmem>>, vector<128x128xbf16>
    %cst_8 = arith.constant dense<0.000000e+00> : vector<128x128xf32>
    %11 = tpu.matmul %9, %10, %cst_8 {dimension_numbers = #tpu.dot_dimension_numbers<[1], [0], [0], [1], [0, 0, 1, 1], [], []>} : vector<128x128xbf16>, vector<128x128xbf16>, vector<128x128xf32> -> vector<128x128xf32>
    %c0_9 = arith.constant 0 : index
    %c0_10 = arith.constant 0 : index
    %12 = vector.load %arg6[%c0_9, %c0_10] : memref<1x128xf32, #tpu.memory_space<vmem>>, vector<1x128xf32>
    %13 = vector.broadcast %12 : vector<1x128xf32> to vector<128x128xf32>
    %14 = arith.addf %11, %13 : vector<128x128xf32>
    %cst_11 = arith.constant 0.000000e+00 : f32
    %15 = vector.broadcast %cst_11 : f32 to vector<128x128xf32>
    %16 = arith.maximumf %14, %15 : vector<128x128xf32>
    %17 = arith.truncf %16 : vector<128x128xf32> to vector<128x128xbf16>
    %c0_12 = arith.constant 0 : index
    %c0_13 = arith.constant 0 : index
    %18 = vector.load %arg7[%c0_12, %c0_13] : memref<128x128xbf16, #tpu.memory_space<vmem>>, vector<128x128xbf16>
    %cst_14 = arith.constant dense<0.000000e+00> : vector<128x128xf32>
    %19 = tpu.matmul %17, %18, %cst_14 {dimension_numbers = #tpu.dot_dimension_numbers<[1], [0], [0], [1], [0, 0, 1, 1], [], []>} : vector<128x128xbf16>, vector<128x128xbf16>, vector<128x128xf32> -> vector<128x128xf32>
    %c0_15 = arith.constant 0 : index
    %c0_16 = arith.constant 0 : index
    %20 = vector.load %arg8[%c0_15, %c0_16] : memref<1x128xf32, #tpu.memory_space<vmem>>, vector<1x128xf32>
    %21 = vector.broadcast %20 : vector<1x128xf32> to vector<128x128xf32>
    %22 = arith.addf %19, %21 : vector<128x128xf32>
    %cst_17 = arith.constant 0.000000e+00 : f32
    %23 = vector.broadcast %cst_17 : f32 to vector<128x128xf32>
    %24 = arith.maximumf %22, %23 : vector<128x128xf32>
    %25 = arith.truncf %24 : vector<128x128xf32> to vector<128x128xbf16>
    %c0_18 = arith.constant 0 : index
    %c0_19 = arith.constant 0 : index
    %26 = vector.load %arg9[%c0_18, %c0_19] : memref<128x128xbf16, #tpu.memory_space<vmem>>, vector<128x128xbf16>
    %cst_20 = arith.constant dense<0.000000e+00> : vector<128x128xf32>
    %27 = tpu.matmul %25, %26, %cst_20 {dimension_numbers = #tpu.dot_dimension_numbers<[1], [0], [0], [1], [0, 0, 1, 1], [], []>} : vector<128x128xbf16>, vector<128x128xbf16>, vector<128x128xf32> -> vector<128x128xf32>
    %c0_21 = arith.constant 0 : index
    %c0_22 = arith.constant 0 : index
    %28 = vector.load %arg10[%c0_21, %c0_22] : memref<1x128xf32, #tpu.memory_space<vmem>>, vector<1x128xf32>
    %29 = vector.broadcast %28 : vector<1x128xf32> to vector<128x128xf32>
    %30 = arith.addf %27, %29 : vector<128x128xf32>
    %c0_23 = arith.constant 0 : index
    %c0_24 = arith.constant 0 : index
    %31 = vector.load %arg2[%c0_23, %c0_24] : memref<128x128xi8, #tpu.memory_space<vmem>>, vector<128x128xi8>
    %c0_i8 = arith.constant 0 : i8
    %32 = vector.broadcast %c0_i8 : i8 to vector<128x128xi8>
    %33 = arith.cmpi ne, %31, %32 : vector<128x128xi8>
    %cst_25 = arith.constant -1.000000e+30 : f32
    %34 = vector.broadcast %cst_25 : f32 to vector<128x128xf32>
    %35 = arith.select %33, %30, %34 : vector<128x128xi1>, vector<128x128xf32>
    %cst_26 = arith.constant dense<0xFF800000> : vector<128xf32>
    %36 = vector.multi_reduction <maximumf>, %35, %cst_26 [1] : vector<128x128xf32> to vector<128xf32>
    %37 = vector.shape_cast %36 : vector<128xf32> to vector<128x1xf32>
    %38 = vector.broadcast %37 : vector<128x1xf32> to vector<128x128xf32>
    %39 = arith.subf %35, %38 : vector<128x128xf32>
    %40 = math.exp %39 : vector<128x128xf32>
    %cst_27 = arith.constant dense<0.000000e+00> : vector<128xf32>
    %41 = vector.multi_reduction <add>, %40, %cst_27 [1] : vector<128x128xf32> to vector<128xf32>
    %42 = vector.shape_cast %41 : vector<128xf32> to vector<128x1xf32>
    %43 = vector.broadcast %42 : vector<128x1xf32> to vector<128x128xf32>
    %44 = arith.divf %40, %43 : vector<128x128xf32>
    %c0_28 = arith.constant 0 : index
    %c0_29 = arith.constant 0 : index
    %45 = vector.load %arg11[%c0_28, %c0_29] : memref<128x128xf32, #tpu.memory_space<vmem>>, vector<128x128xf32>
    tpu.vector_store %arg11[%c0_28, %c0_29], %44 {strides = array<i32>} : memref<128x128xf32, #tpu.memory_space<vmem>>, vector<128x128xf32>,
    return
  }
  func.func @transform_0(%arg0: i32) -> (i32, i32) {
    %c0_i32 = arith.constant 0 : i32
    %c0_i32_0 = arith.constant 0 : i32
    return %arg0, %c0_i32 : i32, i32
  }
  func.func @transform_1(%arg0: i32) -> (i32, i32) {
    %c0_i32 = arith.constant 0 : i32
    %c0_i32_0 = arith.constant 0 : i32
    return %arg0, %c0_i32 : i32, i32
  }
  func.func @transform_2(%arg0: i32) -> (i32, i32) {
    %c0_i32 = arith.constant 0 : i32
    %c0_i32_0 = arith.constant 0 : i32
    %c0_i32_1 = arith.constant 0 : i32
    return %c0_i32, %c0_i32_0 : i32, i32
  }
  func.func @transform_3(%arg0: i32) -> (i32, i32) {
    %c0_i32 = arith.constant 0 : i32
    %c0_i32_0 = arith.constant 0 : i32
    %c0_i32_1 = arith.constant 0 : i32
    return %c0_i32, %c0_i32_0 : i32, i32
  }
  func.func @transform_4(%arg0: i32) -> (i32, i32) {
    %c0_i32 = arith.constant 0 : i32
    %c0_i32_0 = arith.constant 0 : i32
    %c0_i32_1 = arith.constant 0 : i32
    return %c0_i32, %c0_i32_0 : i32, i32
  }
  func.func @transform_5(%arg0: i32) -> (i32, i32) {
    %c0_i32 = arith.constant 0 : i32
    %c0_i32_0 = arith.constant 0 : i32
    %c0_i32_1 = arith.constant 0 : i32
    return %c0_i32, %c0_i32_0 : i32, i32
  }
  func.func @transform_6(%arg0: i32) -> (i32, i32) {
    %c0_i32 = arith.constant 0 : i32
    %c0_i32_0 = arith.constant 0 : i32
    %c0_i32_1 = arith.constant 0 : i32
    return %c0_i32, %c0_i32_0 : i32, i32
  }
  func.func @transform_7(%arg0: i32) -> (i32, i32) {
    %c0_i32 = arith.constant 0 : i32
    %c0_i32_0 = arith.constant 0 : i32
    %c0_i32_1 = arith.constant 0 : i32
    return %c0_i32, %c0_i32_0 : i32, i32
  }
  func.func @transform_8(%arg0: i32) -> (i32, i32) {
    %c0_i32 = arith.constant 0 : i32
    %c0_i32_0 = arith.constant 0 : i32
    %c0_i32_1 = arith.constant 0 : i32
    return %c0_i32, %c0_i32_0 : i32, i32
  }
  func.func @transform_9(%arg0: i32) -> (i32, i32) {
    %c0_i32 = arith.constant 0 : i32
    %c0_i32_0 = arith.constant 0 : i32
    %c0_i32_1 = arith.constant 0 : i32
    return %c0_i32, %c0_i32_0 : i32, i32
  }
  func.func @transform_10(%arg0: i32) -> (i32, i32) {
    %c0_i32 = arith.constant 0 : i32
    %c0_i32_0 = arith.constant 0 : i32
    return %arg0, %c0_i32 : i32, i32
  }
}

</mosaic_0001>

<bundles_post_ra>
// kernel: tpu_custom_call.1
= control target key start
LH: loop header
LB: loop body
LE: loop exit
PB: predicated region body
PF: predicated region fallthrough
CT: control target
= control target key end

     0   :  { %15 = vsyncpa [#allocation3], 0  ;;  %s1834_s0 = inlined_call_operand.vmem [shape: f32[128,32], index: 0, kind: input, shape index: {}]   ;;  %s1835_s1 = inlined_call_operand.vmem [shape: s8[128,128], index: 1, kind: input, shape index: {}]   ;;  %s1836_s2 = inlined_call_operand.hbm [shape: bf16[32,128], index: 2, kind: input, shape index: {}]   ;;  %s1837_s3 = inlined_call_operand.vmem [shape: f32[1,128], index: 3, kind: input, shape index: {}]   ;;  %s1838_s4 = inlined_call_operand.vmem [shape: bf16[128,128], index: 4, kind: input, shape index: {}]   ;;  %s1839_s5 = inlined_call_operand.vmem [shape: f32[1,128], index: 5, kind: input, shape index: {}]   ;;  %s1840_s6 = inlined_call_operand.vmem [shape: bf16[128,128], index: 6, kind: input, shape index: {}]   ;;  %s1841_s7 = inlined_call_operand.vmem [shape: f32[1,128], index: 7, kind: input, shape index: {}]   ;;  %s1842_s8 = inlined_call_operand.hbm [shape: bf16[128,128], index: 8, kind: input, shape index: {}]   ;;  %s1843_s9 = inlined_call_operand.vmem [shape: f32[1,128], index: 9, kind: input, shape index: {}]   ;;  %s1844_s10 = inlined_call_operand.hbm [shape: f32[128,128], index: 10, kind: output, shape index: {}]  }
   0x1   :  { %16 = vsyncpa [#allocation6], 0 }
   0x2   :  { %17 = vsyncpa [#allocation4], 0  ;;  %s26_s15 = sshll.u32 %s1836_s2, 4  ;;  %s1432_s16 = smov [#allocation2]   ;;  %s27_s15 = int_to_ptr.hbm [resolvable:$true] %s26_s15 }
   0x3   :  { %s28_s17 = sshll.u32 %s1432_s16, 4  ;;  %s49_s20 = sshll.u32 %s1842_s8, 4  ;;  %s29_s17 = int_to_ptr.vmem [resolvable:$true] %s28_s17  ;;  %s50_s20 = int_to_ptr.hbm [resolvable:$true] %s49_s20 }
   0x4   :  { %s1433_s21 = smov 64   ;;  %s1434_s22 = smov 4  }
   0x5   :  { %34 = dma.hbm_to_vmem [thread:$0]  %s27_s15, 256, %s29_s17, [#allocation3], %s1433_s21, %s1433_s21, %s1434_s22  }
   0x6   :  { %s1435_s23 = smov [#allocation5]  }
   0x7   :  { %s51_s24 = sshll.u32 %s1435_s23, 4  ;;  %s52_s24 = int_to_ptr.vmem [resolvable:$true] %s51_s24 }
   0x8   :  { %57 = dma.hbm_to_vmem [thread:$0]  %s50_s20, 1024, %s52_s24, [#allocation6], %s1433_s21, %s1433_s21, %s1434_s22  }
   0x9   :  { %1426 = dma.done.wait [#allocation3], 256  }
   0xa   :  { %1427 = vsyncadd [#allocation3], 4294967040 }
   0xb   :  { %1428 = dma.done.wait [#allocation6], 1024  }
   0xc   :  { %1429 = vsyncadd [#allocation6], 4294966272  ;;  %v1253_v0 = vld [vmem:[#allocation2 + $0x8] sm:$0xff]  ;;  %v1252_v1 = vld [vmem:[#allocation2] sm:$0xff]  ;;  %vm115_vm0 = vcmask 261120   ;;  %s1126_s30 = sshll.u32 %s1844_s10, 4  ;;  %s1127_s30 = int_to_ptr.hbm [resolvable:$true] %s1126_s30 }
   0xd   :  { %146 = vmatpush.bf16.msra.mxu0 %v1253_v0  ;;  %v71_v2 = vld [vmem:[%s1834_s0] sm:$0xff]  ;;  %v72_v3 = vld [vmem:[%s1834_s0 + $0x8] sm:$0xff]  ;;  %v73_v5 = vld [vmem:[%s1834_s0 + $0x10] sm:$0xff]  ;;  %s1438_s11 = smov 128   ;;  %s1439_s12 = smov 8  }
   0xe   :  { %v87_v4 = vpack.c.bf16 %v72_v3, %v71_v2  ;;  %v74_v6 = vld [vmem:[%s1834_s0 + $0x18] sm:$0xff]  ;;  %v75_v8 = vld [vmem:[%s1834_s0 + $0x20] sm:$0xff]  ;;  %v76_v9 = vld [vmem:[%s1834_s0 + $0x28] sm:$0xff] }
   0xf   :  { %v88_v7 = vpack.c.bf16 %v74_v6, %v73_v5  ;;  %v89_v10 = vpack.c.bf16 %v76_v9, %v75_v8  ;;  %v77_v11 = vld [vmem:[%s1834_s0 + $0x30] sm:$0xff]  ;;  %v78_v12 = vld [vmem:[%s1834_s0 + $0x38] sm:$0xff]  ;;  %v79_v14 = vld [vmem:[%s1834_s0 + $0x40] sm:$0xff] }
  0x10   :  { %v90_v13 = vpack.c.bf16 %v78_v12, %v77_v11  ;;  %v80_v15 = vld [vmem:[%s1834_s0 + $0x48] sm:$0xff]  ;;  %v1261_v17 = vld [vmem:[%s1838_s4 + $0x38] sm:$0xff]  ;;  %v81_v18 = vld [vmem:[%s1834_s0 + $0x50] sm:$0xff] }
  0x11   :  { %147 = vmatpush.bf16.msra.mxu0 %v1252_v1  ;;  %v91_v16 = vpack.c.bf16 %v80_v15, %v79_v14  ;;  %281 = vmatpush.bf16.msra.mxu1 %v1261_v17  ;;  %v82_v19 = vld [vmem:[%s1834_s0 + $0x58] sm:$0xff]  ;;  %v1260_v21 = vld [vmem:[%s1838_s4 + $0x30] sm:$0xff]  ;;  %v1259_v22 = vld [vmem:[%s1838_s4 + $0x28] sm:$0xff] }
  0x12   :  { %v92_v20 = vpack.c.bf16 %v82_v19, %v81_v18  ;;  %v1258_v23 = vld [vmem:[%s1838_s4 + $0x20] sm:$0xff]  ;;  %v84_v25 = vld [vmem:[%s1834_s0 + $0x68] sm:$0xff]  ;;  %v1257_v26 = vld [vmem:[%s1838_s4 + $0x18] sm:$0xff] }
  0x13   :  { %v83_v24 = vld [vmem:[%s1834_s0 + $0x60] sm:$0xff]  ;;  %v1256_v28 = vld [vmem:[%s1838_s4 + $0x10] sm:$0xff]  ;;  %v1255_v29 = vld [vmem:[%s1838_s4 + $0x8] sm:$0xff] }
  0x14   :  { %1148 = vmatmul.msk.bf16.vlgmr.msra.gmra.mxu0 %vm115_vm0, %v87_v4  ;;  %v93_v27 = vpack.c.bf16 %v84_v25, %v83_v24  ;;  %v1254_v30 = vld [vmem:[%s1838_s4] sm:$0xff]  ;;  %v85_v31 = vld [vmem:[%s1834_s0 + $0x70] sm:$0xff]  ;;  %v86_v32 = vld [vmem:[%s1834_s0 + $0x78] sm:$0xff] }
  0x15   :  { %282 = vmatpush.bf16.msra.mxu1 %v1260_v21  ;;  %v94_v33 = vpack.c.bf16 %v86_v32, %v85_v31  ;;  %v1584_v35 = vld [vmem:[%s1837_s3] ss:$0 sm:$0xff]  ;;  %v1268_v14 = vld [vmem:[%s1840_s6 + $0x30] sm:$0xff]  ;;  %v1265_v21 = vld [vmem:[%s1840_s6 + $0x18] sm:$0xff] }
  0x16   :  { %v1266_v17 = vld [vmem:[%s1840_s6 + $0x20] sm:$0xff]  ;;  %v1264_v25 = vld [vmem:[%s1840_s6 + $0x10] sm:$0xff] }
  0x19   :  { %283 = vmatpush.bf16.msra.mxu1 %v1259_v22 }
  0x1d   :  { %284 = vmatpush.bf16.msra.mxu1 %v1258_v23 }
  0x21   :  { %285 = vmatpush.bf16.msra.mxu1 %v1257_v26 }
  0x24   :  { %1149 = vmatmul.msk.bf16.gmra.mxu0 %vm115_vm0, %v88_v7 }
  0x25   :  { %286 = vmatpush.bf16.msra.mxu1 %v1256_v28  ;;  %v1262_v28 = vld [vmem:[%s1840_s6] sm:$0xff] }
  0x29   :  { %287 = vmatpush.bf16.msra.mxu1 %v1255_v29 }
  0x2d   :  { %288 = vmatpush.bf16.msra.mxu1 %v1254_v30 }
  0x34   :  { %1150 = vmatmul.msk.bf16.gmra.mxu0 %vm115_vm0, %v89_v10  ;;  %v1269_v10 = vld [vmem:[%s1840_s6 + $0x38] sm:$0xff] }
  0x35   :  { %422 = vmatpush.bf16.msra.mxu2 %v1269_v10 }
  0x39   :  { %423 = vmatpush.bf16.msra.mxu2 %v1268_v14  ;;  %v1277_v14 = vld [vmem:[#allocation5 + $0x38] sm:$0xff] }
  0x3a   :  { %563 = vmatpush.bf16.msra.mxu3 %v1277_v14 }
  0x44   :  { %1151 = vmatmul.msk.bf16.gmra.mxu0 %vm115_vm0, %v90_v13 }
  0x54   :  { %1152 = vmatmul.msk.bf16.gmra.mxu0 %vm115_vm0, %v91_v16  ;;  %v1267_v16 = vld [vmem:[%s1840_s6 + $0x28] sm:$0xff] }
  0x55   :  { %424 = vmatpush.bf16.msra.mxu2 %v1267_v16  ;;  %v1276_v16 = vld [vmem:[#allocation5 + $0x30] sm:$0xff] }
  0x56   :  { %564 = vmatpush.bf16.msra.mxu3 %v1276_v16 }
  0x59   :  { %425 = vmatpush.bf16.msra.mxu2 %v1266_v17  ;;  %v1275_v17 = vld [vmem:[#allocation5 + $0x28] sm:$0xff] }
  0x5a   :  { %565 = vmatpush.bf16.msra.mxu3 %v1275_v17 }
  0x5d   :  { %426 = vmatpush.bf16.msra.mxu2 %v1265_v21  ;;  %v1274_v21 = vld [vmem:[#allocation5 + $0x20] sm:$0xff] }
  0x5e   :  { %566 = vmatpush.bf16.msra.mxu3 %v1274_v21 }
  0x61   :  { %427 = vmatpush.bf16.msra.mxu2 %v1264_v25 }
  0x64   :  { %1153 = vmatmul.msk.bf16.gmra.mxu0 %vm115_vm0, %v92_v20 }
  0x74   :  { %1154 = vmatmul.msk.bf16.gmra.mxu0 %vm115_vm0, %v93_v27  ;;  %v1263_v27 = vld [vmem:[%s1840_s6 + $0x8] sm:$0xff] }
  0x75   :  { %428 = vmatpush.bf16.msra.mxu2 %v1263_v27  ;;  %v1272_v27 = vld [vmem:[#allocation5 + $0x10] sm:$0xff] }
  0x79   :  { %429 = vmatpush.bf16.msra.mxu2 %v1262_v28 }
  0x84   :  { %1155 = vmatmul.msk.bf16.gmra.mxu0 %vm115_vm0, %v94_v33 }
  0x91   :  { %v149_v34 = vpop.f32.mrf.mxu0 }
  0x92   :  { %v150_v36 = vadd.f32 %v1584_v35, %v149_v34 }
  0x94   :  { %v189_v39 = vmax.f32 %v150_v36, 0.0 }
  0x99   :  { %v151_v37 = vpop.f32.mrf.mxu0 }
  0x9a   :  { %v152_v38 = vadd.f32 %v1584_v35, %v151_v37  ;;  %v1629_v37 = vld [vmem:[%s1839_s5] ss:$0 sm:$0xff] }
  0x9c   :  { %v190_v40 = vmax.f32 %v152_v38, 0.0 }
  0x9e   :  { %v205_v41 = vpack.c.bf16 %v190_v40, %v189_v39 }
  0xa0   :  { %289 = vmatmul.bf16.vlgmr.msra.gmra.mxu1 %v205_v41 }
  0xa1   :  { %v154_v42 = vpop.f32.mrf.mxu0 }
  0xa2   :  { %v155_v43 = vadd.f32 %v1584_v35, %v154_v42 }
  0xa4   :  { %v191_v46 = vmax.f32 %v155_v43, 0.0 }
  0xa9   :  { %v156_v44 = vpop.f32.mrf.mxu0 }
  0xaa   :  { %v157_v45 = vadd.f32 %v1584_v35, %v156_v44 }
  0xac   :  { %v192_v47 = vmax.f32 %v157_v45, 0.0 }
  0xae   :  { %v206_v48 = vpack.c.bf16 %v192_v47, %v191_v46 }
  0xb0   :  { %294 = vmatmul.bf16.gmra.mxu1 %v206_v48 }
  0xb1   :  { %v159_v49 = vpop.f32.mrf.mxu0 }
  0xb2   :  { %v160_v50 = vadd.f32 %v1584_v35, %v159_v49 }
  0xb4   :  { %v193_v53 = vmax.f32 %v160_v50, 0.0 }
  0xb9   :  { %v161_v51 = vpop.f32.mrf.mxu0 }
  0xba   :  { %v162_v52 = vadd.f32 %v1584_v35, %v161_v51 }
  0xbc   :  { %v194_v54 = vmax.f32 %v162_v52, 0.0 }
  0xbe   :  { %v207_v55 = vpack.c.bf16 %v194_v54, %v193_v53 }
  0xc0   :  { %299 = vmatmul.bf16.gmra.mxu1 %v207_v55 }
  0xc1   :  { %v164_v56 = vpop.f32.mrf.mxu0 }
  0xc2   :  { %v165_v57 = vadd.f32 %v1584_v35, %v164_v56 }
  0xc4   :  { %v195_v60 = vmax.f32 %v165_v57, 0.0 }
  0xc9   :  { %v166_v58 = vpop.f32.mrf.mxu0 }
  0xca   :  { %v167_v59 = vadd.f32 %v1584_v35, %v166_v58 }
  0xcc   :  { %v196_v61 = vmax.f32 %v167_v59, 0.0 }
  0xce   :  { %v208_v62 = vpack.c.bf16 %v196_v61, %v195_v60 }
  0xd0   :  { %304 = vmatmul.bf16.gmra.mxu1 %v208_v62 }
  0xd1   :  { %v169_v63 = vpop.f32.mrf.mxu0 }
  0xd2   :  { %v170_v0 = vadd.f32 %v1584_v35, %v169_v63 }
  0xd4   :  { %v197_v3 = vmax.f32 %v170_v0, 0.0 }
  0xd9   :  { %v171_v1 = vpop.f32.mrf.mxu0 }
  0xda   :  { %v172_v2 = vadd.f32 %v1584_v35, %v171_v1 }
  0xdc   :  { %v198_v4 = vmax.f32 %v172_v2, 0.0 }
  0xde   :  { %v209_v5 = vpack.c.bf16 %v198_v4, %v197_v3 }
  0xe0   :  { %309 = vmatmul.bf16.gmra.mxu1 %v209_v5 }
  0xe1   :  { %v174_v6 = vpop.f32.mrf.mxu0 }
  0xe2   :  { %v175_v7 = vadd.f32 %v1584_v35, %v174_v6 }
  0xe4   :  { %v199_v11 = vmax.f32 %v175_v7, 0.0 }
  0xe9   :  { %v176_v8 = vpop.f32.mrf.mxu0 }
  0xea   :  { %v177_v9 = vadd.f32 %v1584_v35, %v176_v8 }
  0xec   :  { %v200_v12 = vmax.f32 %v177_v9, 0.0 }
  0xee   :  { %v210_v13 = vpack.c.bf16 %v200_v12, %v199_v11 }
  0xf0   :  { %314 = vmatmul.bf16.gmra.mxu1 %v210_v13 }
  0xf1   :  { %v179_v15 = vpop.f32.mrf.mxu0 }
  0xf2   :  { %v180_v18 = vadd.f32 %v1584_v35, %v179_v15 }
  0xf4   :  { %v201_v22 = vmax.f32 %v180_v18, 0.0 }
  0xf9   :  { %v181_v19 = vpop.f32.mrf.mxu0 }
  0xfa   :  { %v182_v20 = vadd.f32 %v1584_v35, %v181_v19 }
  0xfc   :  { %v202_v23 = vmax.f32 %v182_v20, 0.0 }
  0xfe   :  { %v211_v24 = vpack.c.bf16 %v202_v23, %v201_v22 }
 0x100   :  { %319 = vmatmul.bf16.gmra.mxu1 %v211_v24 }
 0x101   :  { %v184_v26 = vpop.f32.mrf.mxu0 }
 0x102   :  { %v185_v29 = vadd.f32 %v1584_v35, %v184_v26  ;;  %v1273_v26 = vld [vmem:[#allocation5 + $0x18] sm:$0xff] }
 0x103   :  { %567 = vmatpush.bf16.msra.mxu3 %v1273_v26 }
 0x104   :  { %v203_v32 = vmax.f32 %v185_v29, 0.0 }
 0x107   :  { %568 = vmatpush.bf16.msra.mxu3 %v1272_v27  ;;  %v1436_v27 = vmov 0  }
 0x109   :  { %v186_v30 = vpop.f32.mrf.mxu0 }
 0x10a   :  { %v187_v31 = vadd.f32 %v1584_v35, %v186_v30  ;;  %v1271_v30 = vld [vmem:[#allocation5 + $0x8] sm:$0xff] }
 0x10b   :  { %569 = vmatpush.bf16.msra.mxu3 %v1271_v30 }
 0x10c   :  { %v204_v33 = vmax.f32 %v187_v31, 0.0 }
 0x10e   :  { %v212_v34 = vpack.c.bf16 %v204_v33, %v203_v32 }
 0x110   :  { %324 = vmatmul.bf16.gmra.mxu1 %v212_v34  ;;  %v1270_v34 = vld [vmem:[#allocation5] sm:$0xff] }
 0x111   :  { %570 = vmatpush.bf16.msra.mxu3 %v1270_v34 }
 0x11d   :  { %v290_v36 = vpop.f32.mrf.mxu1 }
 0x11e   :  { %v291_v38 = vadd.f32 %v1629_v37, %v290_v36 }
 0x120   :  { %v330_v41 = vmax.f32 %v291_v38, 0.0 }
 0x125   :  { %v292_v39 = vpop.f32.mrf.mxu1 }
 0x126   :  { %v293_v40 = vadd.f32 %v1629_v37, %v292_v39  ;;  %v1288_v39 = vld [vmem:[%s1841_s7] ss:$0 sm:$0xff] }
 0x128   :  { %v331_v42 = vmax.f32 %v293_v40, 0.0 }
 0x12a   :  { %v346_v43 = vpack.c.bf16 %v331_v42, %v330_v41 }
 0x12c   :  { %430 = vmatmul.bf16.vlgmr.msra.gmra.mxu2 %v346_v43 }
 0x12d   :  { %v295_v35 = vpop.f32.mrf.mxu1 }
 0x12e   :  { %v296_v44 = vadd.f32 %v1629_v37, %v295_v35 }
 0x130   :  { %v332_v47 = vmax.f32 %v296_v44, 0.0 }
 0x135   :  { %v297_v45 = vpop.f32.mrf.mxu1 }
 0x136   :  { %v298_v46 = vadd.f32 %v1629_v37, %v297_v45 }
 0x138   :  { %v333_v48 = vmax.f32 %v298_v46, 0.0 }
 0x13a   :  { %v347_v49 = vpack.c.bf16 %v333_v48, %v332_v47 }
 0x13c   :  { %435 = vmatmul.bf16.gmra.mxu2 %v347_v49 }
 0x13d   :  { %v300_v50 = vpop.f32.mrf.mxu1 }
 0x13e   :  { %v301_v51 = vadd.f32 %v1629_v37, %v300_v50 }
 0x140   :  { %v334_v54 = vmax.f32 %v301_v51, 0.0 }
 0x145   :  { %v302_v52 = vpop.f32.mrf.mxu1 }
 0x146   :  { %v303_v53 = vadd.f32 %v1629_v37, %v302_v52 }
 0x148   :  { %v335_v55 = vmax.f32 %v303_v53, 0.0 }
 0x14a   :  { %v348_v56 = vpack.c.bf16 %v335_v55, %v334_v54 }
 0x14c   :  { %440 = vmatmul.bf16.gmra.mxu2 %v348_v56 }
 0x14d   :  { %v305_v57 = vpop.f32.mrf.mxu1 }
 0x14e   :  { %v306_v58 = vadd.f32 %v1629_v37, %v305_v57 }
 0x150   :  { %v336_v61 = vmax.f32 %v306_v58, 0.0 }
 0x155   :  { %v307_v59 = vpop.f32.mrf.mxu1 }
 0x156   :  { %v308_v60 = vadd.f32 %v1629_v37, %v307_v59 }
 0x158   :  { %v337_v62 = vmax.f32 %v308_v60, 0.0 }
 0x15a   :  { %v349_v63 = vpack.c.bf16 %v337_v62, %v336_v61 }
 0x15c   :  { %445 = vmatmul.bf16.gmra.mxu2 %v349_v63 }
 0x15d   :  { %v310_v0 = vpop.f32.mrf.mxu1 }
 0x15e   :  { %v311_v1 = vadd.f32 %v1629_v37, %v310_v0 }
 0x160   :  { %v338_v4 = vmax.f32 %v311_v1, 0.0 }
 0x165   :  { %v312_v2 = vpop.f32.mrf.mxu1 }
 0x166   :  { %v313_v3 = vadd.f32 %v1629_v37, %v312_v2 }
 0x168   :  { %v339_v5 = vmax.f32 %v313_v3, 0.0 }
 0x16a   :  { %v350_v6 = vpack.c.bf16 %v339_v5, %v338_v4 }
 0x16c   :  { %450 = vmatmul.bf16.gmra.mxu2 %v350_v6 }
 0x16d   :  { %v315_v7 = vpop.f32.mrf.mxu1 }
 0x16e   :  { %v316_v8 = vadd.f32 %v1629_v37, %v315_v7 }
 0x170   :  { %v340_v11 = vmax.f32 %v316_v8, 0.0 }
 0x175   :  { %v317_v9 = vpop.f32.mrf.mxu1 }
 0x176   :  { %v318_v10 = vadd.f32 %v1629_v37, %v317_v9 }
 0x178   :  { %v341_v12 = vmax.f32 %v318_v10, 0.0 }
 0x17a   :  { %v351_v13 = vpack.c.bf16 %v341_v12, %v340_v11 }
 0x17c   :  { %455 = vmatmul.bf16.gmra.mxu2 %v351_v13 }
 0x17d   :  { %v320_v15 = vpop.f32.mrf.mxu1 }
 0x17e   :  { %v321_v18 = vadd.f32 %v1629_v37, %v320_v15 }
 0x180   :  { %v342_v22 = vmax.f32 %v321_v18, 0.0 }
 0x185   :  { %v322_v19 = vpop.f32.mrf.mxu1 }
 0x186   :  { %v323_v20 = vadd.f32 %v1629_v37, %v322_v19 }
 0x188   :  { %v343_v23 = vmax.f32 %v323_v20, 0.0 }
 0x18a   :  { %v352_v24 = vpack.c.bf16 %v343_v23, %v342_v22  ;;  %v612_v23 = vld [vmem:[%s1835_s1] sm:$0xff] }
 0x18b   :  { %vm616_vm1 = vnez %v612_v23 }
 0x18c   :  { %460 = vmatmul.bf16.gmra.mxu2 %v352_v24 }
 0x18d   :  { %v325_v25 = vpop.f32.mrf.mxu1 }
 0x18e   :  { %v326_v28 = vadd.f32 %v1629_v37, %v325_v25 }
 0x190   :  { %v344_v32 = vmax.f32 %v326_v28, 0.0  ;;  %v620_v28 = vsel %vm616_vm1, 16843009, %v1436_v27 }
 0x195   :  { %v327_v29 = vpop.f32.mrf.mxu1 }
 0x196   :  { %v328_v31 = vadd.f32 %v1629_v37, %v327_v29 }
 0x198   :  { %v345_v33 = vmax.f32 %v328_v31, 0.0  ;;  %v624_v31 = vunpack.c.0.s8 %v620_v28 }
 0x19a   :  { %v353_v36 = vpack.c.bf16 %v345_v33, %v344_v32  ;;  %v640_v33 = vpack.c.b16 %v624_v31, %v624_v31 }
 0x19c   :  { %465 = vmatmul.bf16.gmra.mxu2 %v353_v36  ;;  %v641_v34 = vpack.c.b8 %v640_v33, %v640_v33  ;;  %v625_v36 = vunpack.c.1.s8 %v620_v28 }
 0x19e   :  { %vm672_vm2 = vnez %v641_v34 }
 0x1af   :  { %v431_v38 = vpop.f32.mrf.mxu2 }
 0x1b0   :  { %v432_v40 = vadd.f32 %v1288_v39, %v431_v38  ;;  %v642_v38 = vpack.c.b16 %v625_v36, %v625_v36 }
 0x1b2   :  { %v471_v43 = vmax.f32 %v432_v40, 0.0  ;;  %v688_v40 = vsel %vm672_vm2, 16843009, %v1436_v27 }
 0x1b7   :  { %v433_v41 = vpop.f32.mrf.mxu2 }
 0x1b8   :  { %v434_v42 = vadd.f32 %v1288_v39, %v433_v41  ;;  %v643_v41 = vpack.c.b8 %v642_v38, %v642_v38 }
 0x1ba   :  { %v472_v35 = vmax.f32 %v434_v42, 0.0  ;;  %v626_v42 = vunpack.c.2.s8 %v620_v28  ;;  %vm673_vm3 = vnez %v643_v41 }
 0x1bc   :  { %v487_v44 = vpack.c.bf16 %v472_v35, %v471_v43  ;;  %v704_v43 = vunpack.c.0.s8 %v688_v40  ;;  %v644_v35 = vpack.c.b16 %v626_v42, %v626_v42 }
 0x1be   :  { %571 = vmatmul.bf16.vlgmr.msra.gmra.mxu3 %v487_v44  ;;  %vm720_vm4 = vcmp.ne.s32.totalorder %v704_v43, 0 }
 0x1bf   :  { %v436_v37 = vpop.f32.mrf.mxu2 }
 0x1c0   :  { %v437_v45 = vadd.f32 %v1288_v39, %v436_v37 }
 0x1c2   :  { %v473_v48 = vmax.f32 %v437_v45, 0.0  ;;  %v689_v45 = vsel %vm673_vm3, 16843009, %v1436_v27 }
 0x1c7   :  { %v438_v46 = vpop.f32.mrf.mxu2 }
 0x1c8   :  { %v439_v47 = vadd.f32 %v1288_v39, %v438_v46  ;;  %v613_v46 = vld [vmem:[%s1835_s1 + $0x8] sm:$0xff] }
 0x1c9   :  { %vm617_vm5 = vnez %v613_v46 }
 0x1ca   :  { %v474_v49 = vmax.f32 %v439_v47, 0.0  ;;  %v645_v47 = vpack.c.b8 %v644_v35, %v644_v35 }
 0x1cc   :  { %v488_v50 = vpack.c.bf16 %v474_v49, %v473_v48  ;;  %v627_v48 = vunpack.c.3.s8 %v620_v28  ;;  %vm674_vm6 = vnez %v645_v47 }
 0x1ce   :  { %576 = vmatmul.bf16.gmra.mxu3 %v488_v50  ;;  %v705_v50 = vunpack.c.0.s8 %v689_v45 }
 0x1cf   :  { %v441_v51 = vpop.f32.mrf.mxu2 }
 0x1d0   :  { %v442_v52 = vadd.f32 %v1288_v39, %v441_v51  ;;  %v646_v51 = vpack.c.b16 %v627_v48, %v627_v48  ;;  %vm721_vm7 = vcmp.ne.s32.totalorder %v705_v50, 0 }
 0x1d2   :  { %v475_v55 = vmax.f32 %v442_v52, 0.0  ;;  %v621_v52 = vsel %vm617_vm5, 16843009, %v1436_v27 }
 0x1d7   :  { %v443_v53 = vpop.f32.mrf.mxu2 }
 0x1d8   :  { %v444_v54 = vadd.f32 %v1288_v39, %v443_v53 }
 0x1da   :  { %v476_v56 = vmax.f32 %v444_v54, 0.0 }
 0x1dc   :  { %v489_v57 = vpack.c.bf16 %v476_v56, %v475_v55  ;;  %v690_v55 = vsel %vm674_vm6, 16843009, %v1436_v27  ;;  %v647_v56 = vpack.c.b8 %v646_v51, %v646_v51 }
 0x1de   :  { %581 = vmatmul.bf16.gmra.mxu3 %v489_v57  ;;  %v628_v57 = vunpack.c.0.s8 %v621_v52  ;;  %vm675_vm8 = vnez %v647_v56 }
 0x1df   :  { %v446_v58 = vpop.f32.mrf.mxu2 }
 0x1e0   :  { %v447_v59 = vadd.f32 %v1288_v39, %v446_v58 }
 0x1e2   :  { %v477_v62 = vmax.f32 %v447_v59, 0.0  ;;  %v706_v59 = vunpack.c.0.s8 %v690_v55 }
 0x1e4   :  { %vm722_vm9 = vcmp.ne.s32.totalorder %v706_v59, 0 }
 0x1e7   :  { %v448_v60 = vpop.f32.mrf.mxu2 }
 0x1e8   :  { %v449_v61 = vadd.f32 %v1288_v39, %v448_v60  ;;  %v648_v60 = vpack.c.b16 %v628_v57, %v628_v57 }
 0x1ea   :  { %v478_v63 = vmax.f32 %v449_v61, 0.0 }
 0x1ec   :  { %v490_v0 = vpack.c.bf16 %v478_v63, %v477_v62  ;;  %v691_v63 = vsel %vm675_vm8, 16843009, %v1436_v27 }
 0x1ee   :  { %586 = vmatmul.bf16.gmra.mxu3 %v490_v0  ;;  %v649_v0 = vpack.c.b8 %v648_v60, %v648_v60 }
 0x1ef   :  { %v451_v1 = vpop.f32.mrf.mxu2 }
 0x1f0   :  { %v452_v2 = vadd.f32 %v1288_v39, %v451_v1  ;;  %v629_v1 = vunpack.c.1.s8 %v621_v52  ;;  %vm676_vm10 = vnez %v649_v0 }
 0x1f2   :  { %v479_v5 = vmax.f32 %v452_v2, 0.0 }
 0x1f7   :  { %v453_v3 = vpop.f32.mrf.mxu2 }
 0x1f8   :  { %v454_v4 = vadd.f32 %v1288_v39, %v453_v3  ;;  %v707_v3 = vunpack.c.0.s8 %v691_v63 }
 0x1fa   :  { %v480_v6 = vmax.f32 %v454_v4, 0.0  ;;  %v650_v4 = vpack.c.b16 %v629_v1, %v629_v1  ;;  %vm723_vm11 = vcmp.ne.s32.totalorder %v707_v3, 0 }
 0x1fc   :  { %v491_v7 = vpack.c.bf16 %v480_v6, %v479_v5 }
 0x1fe   :  { %591 = vmatmul.bf16.gmra.mxu3 %v491_v7  ;;  %v692_v7 = vsel %vm676_vm10, 16843009, %v1436_v27 }
 0x1ff   :  { %v456_v8 = vpop.f32.mrf.mxu2 }
 0x200   :  { %v457_v9 = vadd.f32 %v1288_v39, %v456_v8  ;;  %v651_v8 = vpack.c.b8 %v650_v4, %v650_v4 }
 0x202   :  { %v481_v12 = vmax.f32 %v457_v9, 0.0  ;;  %v630_v9 = vunpack.c.2.s8 %v621_v52  ;;  %vm677_vm12 = vnez %v651_v8 }
 0x207   :  { %v458_v10 = vpop.f32.mrf.mxu2 }
 0x208   :  { %v459_v11 = vadd.f32 %v1288_v39, %v458_v10 }
 0x20a   :  { %v482_v13 = vmax.f32 %v459_v11, 0.0  ;;  %v708_v11 = vunpack.c.0.s8 %v692_v7 }
 0x20c   :  { %v492_v14 = vpack.c.bf16 %v482_v13, %v481_v12  ;;  %v652_v12 = vpack.c.b16 %v630_v9, %v630_v9  ;;  %vm724_vm13 = vcmp.ne.s32.totalorder %v708_v11, 0 }
 0x20e   :  { %596 = vmatmul.bf16.gmra.mxu3 %v492_v14 }
 0x20f   :  { %v461_v15 = vpop.f32.mrf.mxu2 }
 0x210   :  { %v462_v16 = vadd.f32 %v1288_v39, %v461_v15  ;;  %v693_v15 = vsel %vm677_vm12, 16843009, %v1436_v27 }
 0x212   :  { %v483_v19 = vmax.f32 %v462_v16, 0.0  ;;  %v614_v16 = vld [vmem:[%s1835_s1 + $0x10] sm:$0xff] }
 0x213   :  { %vm618_vm14 = vnez %v614_v16 }
 0x217   :  { %v463_v17 = vpop.f32.mrf.mxu2 }
 0x218   :  { %v464_v18 = vadd.f32 %v1288_v39, %v463_v17  ;;  %v653_v17 = vpack.c.b8 %v652_v12, %v652_v12 }
 0x21a   :  { %v484_v20 = vmax.f32 %v464_v18, 0.0  ;;  %v631_v18 = vunpack.c.3.s8 %v621_v52  ;;  %vm678_vm15 = vnez %v653_v17 }
 0x21c   :  { %v493_v21 = vpack.c.bf16 %v484_v20, %v483_v19  ;;  %v709_v20 = vunpack.c.0.s8 %v693_v15 }
 0x21e   :  { %601 = vmatmul.bf16.gmra.mxu3 %v493_v21  ;;  %v654_v21 = vpack.c.b16 %v631_v18, %v631_v18  ;;  %vm725_vm0 = vcmp.ne.s32.totalorder %v709_v20, 0 }
 0x21f   :  { %v466_v22 = vpop.f32.mrf.mxu2 }
 0x220   :  { %v467_v24 = vadd.f32 %v1288_v39, %v466_v22  ;;  %v622_v22 = vsel %vm618_vm14, 16843009, %v1436_v27 }
 0x221   :  { %v632_v28 = vunpack.c.0.s8 %v622_v22  ;;  %v633_v38 = vunpack.c.1.s8 %v622_v22  ;;  %v634_v45 = vunpack.c.2.s8 %v622_v22  ;;  %v635_v55 = vunpack.c.3.s8 %v622_v22 }
 0x222   :  { %v485_v29 = vmax.f32 %v467_v24, 0.0 }
 0x223   :  { %v656_v31 = vpack.c.b16 %v632_v28, %v632_v28  ;;  %v658_v42 = vpack.c.b16 %v633_v38, %v633_v38  ;;  %v660_v48 = vpack.c.b16 %v634_v45, %v634_v45  ;;  %v662_v59 = vpack.c.b16 %v635_v55, %v635_v55 }
 0x225   :  { %v657_v36 = vpack.c.b8 %v656_v31, %v656_v31  ;;  %v663_v0 = vpack.c.b8 %v662_v59, %v662_v59 }
 0x227   :  { %v468_v25 = vpop.f32.mrf.mxu2  ;;  %vm680_vm3 = vnez %v657_v36  ;;  %vm683_vm10 = vnez %v663_v0 }
 0x228   :  { %v469_v26 = vadd.f32 %v1288_v39, %v468_v25  ;;  %v1658_v39 = vld [vmem:[%s1843_s9] ss:$0 sm:$0xff]  ;;  %v694_v25 = vsel %vm678_vm15, 16843009, %v1436_v27  ;;  %v699_v8 = vsel %vm683_vm10, 16843009, %v1436_v27 }
 0x22a   :  { %v486_v30 = vmax.f32 %v469_v26, 0.0  ;;  %v655_v26 = vpack.c.b8 %v654_v21, %v654_v21 }
 0x22c   :  { %v494_v32 = vpack.c.bf16 %v486_v30, %v485_v29  ;;  %v710_v30 = vunpack.c.0.s8 %v694_v25  ;;  %vm679_vm1 = vnez %v655_v26 }
 0x22d   :  { %v695_v34 = vsel %vm679_vm1, 16843009, %v1436_v27 }
 0x22e   :  { %606 = vmatmul.bf16.gmra.mxu3 %v494_v32  ;;  %vm726_vm2 = vcmp.ne.s32.totalorder %v710_v30, 0  ;;  %v711_v41 = vunpack.c.0.s8 %v695_v34 }
 0x241   :  { %v572_v44 = vpop.f32.mrf.mxu3 }
 0x242   :  { %v573_v37 = vadd.f32 %v1658_v39, %v572_v44  ;;  %v696_v44 = vsel %vm680_vm3, 16843009, %v1436_v27 }
 0x243   :  { %v712_v47 = vunpack.c.0.s8 %v696_v44 }
 0x244   :  { %v1665_v49 = vsel %vm720_vm4, %v573_v37, -1e+30  ;;  %vm727_vm4 = vcmp.ne.s32.totalorder %v711_v41, 0  ;;  %v659_v37 = vpack.c.b8 %v658_v42, %v658_v42 }
 0x245   :  { %752 = vmax.xlane.f32.xlu0 %v1665_v49  ;;  %vm728_vm6 = vcmp.ne.s32.totalorder %v712_v47, 0 }
 0x246   :  { %vm681_vm5 = vnez %v659_v37 }
 0x247   :  { %v697_v52 = vsel %vm681_vm5, 16843009, %v1436_v27 }
 0x248   :  { %v713_v57 = vunpack.c.0.s8 %v697_v52 }
 0x249   :  { %v574_v53 = vpop.f32.mrf.mxu3 }
 0x24a   :  { %v575_v54 = vadd.f32 %v1658_v39, %v574_v53  ;;  %v615_v53 = vld [vmem:[%s1835_s1 + $0x18] sm:$0xff]  ;;  %s1437_s1 = smov [#allocation7]  }
 0x24b   :  { %s1124_s3 = sshll.u32 %s1437_s1, 4  ;;  %s1125_s3 = int_to_ptr.vmem [resolvable:$true] %s1124_s3 }
 0x24c   :  { %v1671_v58 = vsel %vm721_vm7, %v575_v54, -1e+30  ;;  %v661_v54 = vpack.c.b8 %v660_v48, %v660_v48  ;;  %vm619_vm7 = vnez %v615_v53 }
 0x24d   :  { %754 = vmax.xlane.f32.xlu0 %v1671_v58  ;;  %v623_v60 = vsel %vm619_vm7, 16843009, %v1436_v27 }
 0x24e   :  { %vm682_vm8 = vnez %v661_v54  ;;  %v636_v1 = vunpack.c.0.s8 %v623_v60  ;;  %v637_v11 = vunpack.c.1.s8 %v623_v60  ;;  %v638_v20 = vunpack.c.2.s8 %v623_v60 }
 0x24f   :  { %v698_v63 = vsel %vm682_vm8, 16843009, %v1436_v27  ;;  %v639_v30 = vunpack.c.3.s8 %v623_v60 }
 0x250   :  { %v714_v4 = vunpack.c.0.s8 %v698_v63 }
 0x251   :  { %v577_v61 = vpop.f32.mrf.mxu3 }
 0x252   :  { %v578_v62 = vadd.f32 %v1658_v39, %v577_v61 }
 0x254   :  { %v1676_v2 = vsel %vm722_vm9, %v578_v62, -1e+30  ;;  %vm729_vm9 = vcmp.ne.s32.totalorder %v713_v57, 0 }
 0x255   :  { %756 = vmax.xlane.f32.xlu1 %v1676_v2 }
 0x259   :  { %v579_v5 = vpop.f32.mrf.mxu3 }
 0x25a   :  { %v580_v6 = vadd.f32 %v1658_v39, %v579_v5  ;;  %v664_v5 = vpack.c.b16 %v636_v1, %v636_v1 }
 0x25c   :  { %v1681_v10 = vsel %vm723_vm11, %v580_v6, -1e+30  ;;  %vm730_vm11 = vcmp.ne.s32.totalorder %v714_v4, 0  ;;  %v665_v9 = vpack.c.b8 %v664_v5, %v664_v5 }
 0x25d   :  { %758 = vmax.xlane.f32.xlu1 %v1681_v10 }
 0x25e   :  { %vm684_vm12 = vnez %v665_v9 }
 0x25f   :  { %v700_v17 = vsel %vm684_vm12, 16843009, %v1436_v27 }
 0x260   :  { %v716_v22 = vunpack.c.0.s8 %v700_v17 }
 0x261   :  { %v582_v13 = vpop.f32.mrf.mxu3 }
 0x262   :  { %v583_v14 = vadd.f32 %v1658_v39, %v582_v13  ;;  %v715_v13 = vunpack.c.0.s8 %v699_v8  ;;  %vm732_vm15 = vcmp.ne.s32.totalorder %v716_v22, 0 }
 0x264   :  { %v1689_v19 = vsel %vm724_vm13, %v583_v14, -1e+30  ;;  %v666_v14 = vpack.c.b16 %v637_v11, %v637_v11  ;;  %vm731_vm13 = vcmp.ne.s32.totalorder %v715_v13, 0 }
 0x265   :  { %760 = vmax.xlane.f32.xlu2 %v1689_v19 }
 0x266   :  { %v667_v18 = vpack.c.b8 %v666_v14, %v666_v14 }
 0x268   :  { %vm685_vm14 = vnez %v667_v18 }
 0x269   :  { %v584_v23 = vpop.f32.mrf.mxu3  ;;  %v701_v26 = vsel %vm685_vm14, 16843009, %v1436_v27 }
 0x26a   :  { %v585_v24 = vadd.f32 %v1658_v39, %v584_v23  ;;  %v668_v23 = vpack.c.b16 %v638_v20, %v638_v20 }
 0x26c   :  { %v1695_v29 = vsel %vm725_vm0, %v585_v24, -1e+30  ;;  %v669_v28 = vpack.c.b8 %v668_v23, %v668_v23 }
 0x26d   :  { %762 = vmax.xlane.f32.xlu2 %v1695_v29 }
 0x26e   :  { %vm686_vm0 = vnez %v669_v28 }
 0x26f   :  { %v702_v38 = vsel %vm686_vm0, 16843009, %v1436_v27 }
 0x271   :  { %v587_v32 = vpop.f32.mrf.mxu3 }
 0x272   :  { %v588_v33 = vadd.f32 %v1658_v39, %v587_v32  ;;  %v717_v32 = vunpack.c.0.s8 %v701_v26 }
 0x274   :  { %v1700_v40 = vsel %vm726_vm2, %v588_v33, -1e+30  ;;  %v670_v33 = vpack.c.b16 %v639_v30, %v639_v30  ;;  %vm733_vm1 = vcmp.ne.s32.totalorder %v717_v32, 0 }
 0x275   :  { %764 = vmax.xlane.f32.xlu0 %v1700_v40 }
 0x276   :  { %v671_v41 = vpack.c.b8 %v670_v33, %v670_v33 }
 0x278   :  { %vm687_vm2 = vnez %v671_v41 }
 0x279   :  { %v589_v43 = vpop.f32.mrf.mxu3  ;;  %v703_v37 = vsel %vm687_vm2, 16843009, %v1436_v27 }
 0x27a   :  { %v590_v35 = vadd.f32 %v1658_v39, %v589_v43  ;;  %v718_v43 = vunpack.c.0.s8 %v702_v38  ;;  %v719_v47 = vunpack.c.0.s8 %v703_v37 }
 0x27c   :  { %v1705_v46 = vsel %vm727_vm4, %v590_v35, -1e+30  ;;  %vm734_vm3 = vcmp.ne.s32.totalorder %v718_v43, 0  ;;  %vm735_vm4 = vcmp.ne.s32.totalorder %v719_v47, 0 }
 0x27d   :  { %766 = vmax.xlane.f32.xlu1 %v1705_v46 }
 0x281   :  { %v592_v50 = vpop.f32.mrf.mxu3 }
 0x282   :  { %v593_v51 = vadd.f32 %v1658_v39, %v592_v50 }
 0x284   :  { %v1713_v56 = vsel %vm728_vm6, %v593_v51, -1e+30 }
 0x285   :  { %768 = vmax.xlane.f32.xlu2 %v1713_v56 }
 0x289   :  { %v594_v61 = vpop.f32.mrf.mxu3 }
 0x28a   :  { %v595_v62 = vadd.f32 %v1658_v39, %v594_v61 }
 0x28c   :  { %v1719_v3 = vsel %vm729_vm9, %v595_v62, -1e+30 }
 0x28d   :  { %770 = vmax.xlane.f32.xlu0 %v1719_v3 }
 0x291   :  { %v597_v6 = vpop.f32.mrf.mxu3 }
 0x292   :  { %v598_v7 = vadd.f32 %v1658_v39, %v597_v6 }
 0x294   :  { %v1724_v12 = vsel %vm730_vm11, %v598_v7, -1e+30 }
 0x295   :  { %772 = vmax.xlane.f32.xlu1 %v1724_v12 }
 0x299   :  { %v599_v15 = vpop.f32.mrf.mxu3 }
 0x29a   :  { %v600_v16 = vadd.f32 %v1658_v39, %v599_v15 }
 0x29c   :  { %v1729_v21 = vsel %vm731_vm13, %v600_v16, -1e+30 }
 0x29d   :  { %774 = vmax.xlane.f32.xlu2 %v1729_v21 }
 0x2a1   :  { %v602_v24 = vpop.f32.mrf.mxu3 }
 0x2a2   :  { %v603_v25 = vadd.f32 %v1658_v39, %v602_v24 }
 0x2a4   :  { %v1734_v31 = vsel %vm732_vm15, %v603_v25, -1e+30 }
 0x2a5   :  { %776 = vmax.xlane.f32.xlu0 %v1734_v31 }
 0x2a9   :  { %v604_v34 = vpop.f32.mrf.mxu3 }
 0x2aa   :  { %v605_v36 = vadd.f32 %v1658_v39, %v604_v34 }
 0x2ac   :  { %v1739_v42 = vsel %vm733_vm1, %v605_v36, -1e+30 }
 0x2ad   :  { %778 = vmax.xlane.f32.xlu1 %v1739_v42 }
 0x2b1   :  { %v607_v35 = vpop.f32.mrf.mxu3 }
 0x2b2   :  { %v608_v44 = vadd.f32 %v1658_v39, %v607_v35 }
 0x2b4   :  { %v1744_v45 = vsel %vm734_vm3, %v608_v44, -1e+30 }
 0x2b5   :  { %780 = vmax.xlane.f32.xlu2 %v1744_v45 }
 0x2b8   :  { %v753_v48 = vpop.xlane.xlu0 %752 }
 0x2b9   :  { %v784_v50 = vsub.f32 %v1665_v49, %v753_v48  ;;  %v609_v51 = vpop.f32.mrf.mxu3 }
 0x2ba   :  { %v610_v52 = vadd.f32 %v1658_v39, %v609_v51 }
 0x2bb   :  { %v800_v53 = vmul.f32 1.442695, %v784_v50 }
 0x2bc   :  { %v1749_v54 = vsel %vm735_vm4, %v610_v52, -1e+30 }
 0x2bd   :  { %1290 = vpow2.f32 %v800_v53  ;;  %782 = vmax.xlane.f32.xlu0 %v1749_v54 }
 0x2c0   :  { %v755_v55 = vpop.xlane.xlu0 %754 }
 0x2c1   :  { %v785_v27 = vsub.f32 %v1671_v58, %v755_v55 }
 0x2c3   :  { %v1753_v57 = vpop.eup %1290  ;;  %v802_v59 = vmul.f32 1.442695, %v785_v27 }
 0x2c4   :  { %832 = vadd.xlane.f32.xlu1 %v1753_v57 }
 0x2c5   :  { %1292 = vpow2.f32 %v802_v59 }
 0x2c8   :  { %v757_v49 = vpop.xlane.xlu1 %756 }
 0x2c9   :  { %v786_v60 = vsub.f32 %v1676_v2, %v757_v49 }
 0x2cb   :  { %v1757_v61 = vpop.eup %1292  ;;  %v804_v39 = vmul.f32 1.442695, %v786_v60 }
 0x2cc   :  { %834 = vadd.xlane.f32.xlu2 %v1757_v61 }
 0x2cd   :  { %1294 = vpow2.f32 %v804_v39 }
 0x2d0   :  { %v759_v62 = vpop.xlane.xlu1 %758 }
 0x2d1   :  { %v787_v63 = vsub.f32 %v1681_v10, %v759_v62 }
 0x2d3   :  { %v1761_v0 = vpop.eup %1294  ;;  %v806_v58 = vmul.f32 1.442695, %v787_v63 }
 0x2d4   :  { %836 = vadd.xlane.f32.xlu0 %v1761_v0 }
 0x2d5   :  { %1296 = vpow2.f32 %v806_v58 }
 0x2d8   :  { %v761_v1 = vpop.xlane.xlu2 %760 }
 0x2d9   :  { %v788_v4 = vsub.f32 %v1689_v19, %v761_v1 }
 0x2db   :  { %v1765_v5 = vpop.eup %1296  ;;  %v808_v2 = vmul.f32 1.442695, %v788_v4 }
 0x2dc   :  { %838 = vadd.xlane.f32.xlu1 %v1765_v5 }
 0x2dd   :  { %1298 = vpow2.f32 %v808_v2 }
 0x2e0   :  { %v763_v6 = vpop.xlane.xlu2 %762 }
 0x2e1   :  { %v789_v7 = vsub.f32 %v1695_v29, %v763_v6 }
 0x2e3   :  { %v1769_v8 = vpop.eup %1298  ;;  %v810_v10 = vmul.f32 1.442695, %v789_v7 }
 0x2e4   :  { %840 = vadd.xlane.f32.xlu2 %v1769_v8 }
 0x2e5   :  { %1300 = vpow2.f32 %v810_v10 }
 0x2e8   :  { %v765_v9 = vpop.xlane.xlu0 %764 }
 0x2e9   :  { %v790_v11 = vsub.f32 %v1700_v40, %v765_v9 }
 0x2eb   :  { %v1773_v13 = vpop.eup %1300  ;;  %v812_v19 = vmul.f32 1.442695, %v790_v11 }
 0x2ec   :  { %842 = vadd.xlane.f32.xlu0 %v1773_v13 }
 0x2ed   :  { %1302 = vpow2.f32 %v812_v19 }
 0x2f0   :  { %v767_v14 = vpop.xlane.xlu1 %766 }
 0x2f1   :  { %v791_v15 = vsub.f32 %v1705_v46, %v767_v14 }
 0x2f3   :  { %v1777_v16 = vpop.eup %1302  ;;  %v814_v29 = vmul.f32 1.442695, %v791_v15 }
 0x2f4   :  { %844 = vadd.xlane.f32.xlu1 %v1777_v16 }
 0x2f5   :  { %1304 = vpow2.f32 %v814_v29 }
 0x2f8   :  { %v769_v17 = vpop.xlane.xlu2 %768 }
 0x2f9   :  { %v792_v18 = vsub.f32 %v1713_v56, %v769_v17 }
 0x2fb   :  { %v1781_v20 = vpop.eup %1304  ;;  %v816_v40 = vmul.f32 1.442695, %v792_v18 }
 0x2fc   :  { %846 = vadd.xlane.f32.xlu2 %v1781_v20 }
 0x2fd   :  { %1306 = vpow2.f32 %v816_v40 }
 0x300   :  { %v771_v22 = vpop.xlane.xlu0 %770 }
 0x301   :  { %v793_v23 = vsub.f32 %v1719_v3, %v771_v22 }
 0x303   :  { %v1785_v24 = vpop.eup %1306  ;;  %v818_v46 = vmul.f32 1.442695, %v793_v23 }
 0x304   :  { %848 = vadd.xlane.f32.xlu0 %v1785_v24 }
 0x305   :  { %1308 = vpow2.f32 %v818_v46 }
 0x308   :  { %v773_v25 = vpop.xlane.xlu1 %772 }
 0x309   :  { %v794_v26 = vsub.f32 %v1724_v12, %v773_v25 }
 0x30b   :  { %v1789_v28 = vpop.eup %1308  ;;  %v820_v56 = vmul.f32 1.442695, %v794_v26 }
 0x30c   :  { %850 = vadd.xlane.f32.xlu1 %v1789_v28 }
 0x30d   :  { %1310 = vpow2.f32 %v820_v56 }
 0x310   :  { %v775_v30 = vpop.xlane.xlu2 %774 }
 0x311   :  { %v795_v32 = vsub.f32 %v1729_v21, %v775_v30 }
 0x313   :  { %v1793_v33 = vpop.eup %1310  ;;  %v822_v3 = vmul.f32 1.442695, %v795_v32 }
 0x314   :  { %852 = vadd.xlane.f32.xlu2 %v1793_v33 }
 0x315   :  { %1312 = vpow2.f32 %v822_v3 }
 0x318   :  { %v777_v34 = vpop.xlane.xlu0 %776 }
 0x319   :  { %v796_v36 = vsub.f32 %v1734_v31, %v777_v34 }
 0x31b   :  { %v1797_v38 = vpop.eup %1312  ;;  %v824_v12 = vmul.f32 1.442695, %v796_v36 }
 0x31c   :  { %854 = vadd.xlane.f32.xlu0 %v1797_v38 }
 0x31d   :  { %1314 = vpow2.f32 %v824_v12 }
 0x320   :  { %v779_v41 = vpop.xlane.xlu1 %778 }
 0x321   :  { %v797_v43 = vsub.f32 %v1739_v42, %v779_v41 }
 0x323   :  { %v1801_v35 = vpop.eup %1314  ;;  %v826_v21 = vmul.f32 1.442695, %v797_v43 }
 0x324   :  { %856 = vadd.xlane.f32.xlu1 %v1801_v35 }
 0x325   :  { %1316 = vpow2.f32 %v826_v21 }
 0x328   :  { %v781_v44 = vpop.xlane.xlu2 %780 }
 0x329   :  { %v798_v37 = vsub.f32 %v1744_v45, %v781_v44 }
 0x32b   :  { %v1805_v47 = vpop.eup %1316  ;;  %v828_v31 = vmul.f32 1.442695, %v798_v37 }
 0x32c   :  { %858 = vadd.xlane.f32.xlu2 %v1805_v47 }
 0x32d   :  { %1318 = vpow2.f32 %v828_v31 }
 0x330   :  { %v783_v48 = vpop.xlane.xlu0 %782 }
 0x331   :  { %v799_v50 = vsub.f32 %v1749_v54, %v783_v48 }
 0x333   :  { %v1809_v51 = vpop.eup %1318  ;;  %v830_v42 = vmul.f32 1.442695, %v799_v50 }
 0x334   :  { %860 = vadd.xlane.f32.xlu0 %v1809_v51 }
 0x335   :  { %1320 = vpow2.f32 %v830_v42 }
 0x337   :  { %v833_v52 = vpop.xlane.xlu1 %832 }
 0x338   :  { %1322 = vrcp.f32 %v833_v52  ;;  %v875_v49 = vand.u32 2147483648, %v833_v52  ;;  %v873_v54 = vand.u32 2147483647, %v833_v52  ;;  %vm869_vm6 = vweird.f32 %v833_v52 }
 0x33a   :  { %v876_v63 = vor.u32 1.1754944e-38, %v875_v49  ;;  %vm874_vm8 = vcmp.eq.f32.partialorder %v873_v54, 8.507059e+37 }
 0x33b   :  { %v1812_v53 = vpop.eup %1320 }
 0x33c   :  { %862 = vadd.xlane.f32.xlu1 %v1812_v53 }
 0x33e   :  { %v1323_v45 = vpop.eup %1322 }
 0x33f   :  { %v865_v55 = vmul.f32 %v1323_v45, %v833_v52  ;;  %v835_v27 = vpop.xlane.xlu2 %834  ;;  %vm870_vm5 = vweird.f32 %v1323_v45 }
 0x340   :  { %1324 = vrcp.f32 %v835_v27  ;;  %vm871_vm7 = vmor %vm869_vm6, %vm870_vm5  ;;  %v890_v10 = vand.u32 2147483648, %v835_v27  ;;  %v888_v11 = vand.u32 2147483647, %v835_v27  ;;  %vm884_vm10 = vweird.f32 %v835_v27 }
 0x341   :  { %v866_v59 = vsub.f32 1.0, %v865_v55 }
 0x342   :  { %v891_v15 = vor.u32 1.1754944e-38, %v890_v10  ;;  %vm889_vm12 = vcmp.eq.f32.partialorder %v888_v11, 8.507059e+37 }
 0x343   :  { %v867_v60 = vmul.f32 %v1323_v45, %v866_v59 }
 0x345   :  { %v868_v39 = vadd.f32 %v1323_v45, %v867_v60 }
 0x346   :  { %v1325_v62 = vpop.eup %1324 }
 0x347   :  { %v872_v58 = vsel %vm871_vm7, %v1323_v45, %v868_v39  ;;  %v880_v1 = vmul.f32 %v1325_v62, %v835_v27  ;;  %v837_v4 = vpop.xlane.xlu0 %836  ;;  %vm885_vm9 = vweird.f32 %v1325_v62 }
 0x348   :  { %v877_v2 = vsel %vm874_vm8, %v876_v63, %v872_v58  ;;  %1326 = vrcp.f32 %v837_v4  ;;  %vm886_vm11 = vmor %vm884_vm10, %vm885_vm9  ;;  %v905_v23 = vand.u32 2147483648, %v837_v4  ;;  %v903_v25 = vand.u32 2147483647, %v837_v4 }
 0x349   :  { %v878_v6 = vmul.f32 %v1753_v57, %v877_v2  ;;  %v881_v7 = vsub.f32 1.0, %v880_v1  ;;  %vm899_vm14 = vweird.f32 %v837_v4 }
 0x34a   :  { %v906_v30 = vor.u32 1.1754944e-38, %v905_v23  ;;  %vm904_vm0 = vcmp.eq.f32.partialorder %v903_v25, 8.507059e+37 }
 0x34b   :  { %1104 = vst [vmem:[#allocation7] sm:$0xff] %v878_v6  ;;  %v882_v9 = vmul.f32 %v1325_v62, %v881_v7 }
 0x34d   :  { %v883_v19 = vadd.f32 %v1325_v62, %v882_v9 }
 0x34e   :  { %v1327_v14 = vpop.eup %1326 }
 0x34f   :  { %v887_v29 = vsel %vm886_vm11, %v1325_v62, %v883_v19  ;;  %v895_v17 = vmul.f32 %v1327_v14, %v837_v4  ;;  %v839_v18 = vpop.xlane.xlu1 %838  ;;  %vm900_vm13 = vweird.f32 %v1327_v14 }
 0x350   :  { %v892_v40 = vsel %vm889_vm12, %v891_v15, %v887_v29  ;;  %1328 = vrcp.f32 %v839_v18  ;;  %vm901_vm15 = vmor %vm899_vm14, %vm900_vm13  ;;  %v920_v41 = vand.u32 2147483648, %v839_v18  ;;  %v918_v21 = vand.u32 2147483647, %v839_v18 }
 0x351   :  { %v893_v22 = vmul.f32 %v1757_v61, %v892_v40  ;;  %v896_v57 = vsub.f32 1.0, %v895_v17  ;;  %vm914_vm2 = vweird.f32 %v839_v18 }
 0x352   :  { %v921_v31 = vor.u32 1.1754944e-38, %v920_v41  ;;  %vm919_vm4 = vcmp.eq.f32.partialorder %v918_v21, 8.507059e+37 }
 0x353   :  { %1105 = vst [vmem:[#allocation7 + $0x8] sm:$0xff] %v893_v22  ;;  %v897_v46 = vmul.f32 %v1327_v14, %v896_v57 }
 0x355   :  { %v898_v26 = vadd.f32 %v1327_v14, %v897_v46 }
 0x356   :  { %v1329_v56 = vpop.eup %1328 }
 0x357   :  { %v902_v32 = vsel %vm901_vm15, %v1327_v14, %v898_v26  ;;  %v910_v3 = vmul.f32 %v1329_v56, %v839_v18  ;;  %v841_v34 = vpop.xlane.xlu2 %840  ;;  %vm915_vm1 = vweird.f32 %v1329_v56 }
 0x358   :  { %v907_v36 = vsel %vm904_vm0, %v906_v30, %v902_v32  ;;  %1330 = vrcp.f32 %v841_v34  ;;  %vm916_vm3 = vmor %vm914_vm2, %vm915_vm1  ;;  %v935_v55 = vand.u32 2147483648, %v841_v34  ;;  %v933_v59 = vand.u32 2147483647, %v841_v34 }
 0x359   :  { %v908_v12 = vmul.f32 %v1761_v0, %v907_v36  ;;  %v911_v61 = vsub.f32 1.0, %v910_v3  ;;  %vm929_vm6 = vweird.f32 %v841_v34 }
 0x35a   :  { %v936_v54 = vor.u32 1.1754944e-38, %v935_v55  ;;  %vm934_vm8 = vcmp.eq.f32.partialorder %v933_v59, 8.507059e+37 }
 0x35b   :  { %1106 = vst [vmem:[#allocation7 + $0x10] sm:$0xff] %v908_v12  ;;  %v912_v43 = vmul.f32 %v1329_v56, %v911_v61 }
 0x35d   :  { %v913_v44 = vadd.f32 %v1329_v56, %v912_v43 }
 0x35e   :  { %v1331_v37 = vpop.eup %1330 }
 0x35f   :  { %v917_v48 = vsel %vm916_vm3, %v1329_v56, %v913_v44  ;;  %v925_v50 = vmul.f32 %v1331_v37, %v841_v34  ;;  %v843_v42 = vpop.xlane.xlu0 %842  ;;  %vm930_vm5 = vweird.f32 %v1331_v37 }
 0x360   :  { %v922_v52 = vsel %vm919_vm4, %v921_v31, %v917_v48  ;;  %1332 = vrcp.f32 %v843_v42  ;;  %vm931_vm7 = vmor %vm929_vm6, %vm930_vm5  ;;  %v950_v4 = vand.u32 2147483648, %v843_v42  ;;  %v948_v6 = vand.u32 2147483647, %v843_v42 }
 0x361   :  { %v923_v45 = vmul.f32 %v1765_v5, %v922_v52  ;;  %v926_v0 = vsub.f32 1.0, %v925_v50  ;;  %vm944_vm10 = vweird.f32 %v843_v42 }
 0x362   :  { %v951_v9 = vor.u32 1.1754944e-38, %v950_v4  ;;  %vm949_vm12 = vcmp.eq.f32.partialorder %v948_v6, 8.507059e+37 }
 0x363   :  { %1107 = vst [vmem:[#allocation7 + $0x18] sm:$0xff] %v923_v45  ;;  %v927_v27 = vmul.f32 %v1331_v37, %v926_v0 }
 0x365   :  { %v928_v49 = vadd.f32 %v1331_v37, %v927_v27 }
 0x366   :  { %v1333_v60 = vpop.eup %1332 }
 0x367   :  { %v932_v39 = vsel %vm931_vm7, %v1331_v37, %v928_v49  ;;  %v940_v62 = vmul.f32 %v1333_v60, %v843_v42  ;;  %v845_v63 = vpop.xlane.xlu1 %844  ;;  %vm945_vm9 = vweird.f32 %v1333_v60 }
 0x368   :  { %v937_v58 = vsel %vm934_vm8, %v936_v54, %v932_v39  ;;  %1334 = vrcp.f32 %v845_v63  ;;  %vm946_vm11 = vmor %vm944_vm10, %vm945_vm9  ;;  %v965_v17 = vand.u32 2147483648, %v845_v63  ;;  %v963_v40 = vand.u32 2147483647, %v845_v63 }
 0x369   :  { %v938_v1 = vmul.f32 %v1769_v8, %v937_v58  ;;  %v941_v5 = vsub.f32 1.0, %v940_v62  ;;  %vm959_vm14 = vweird.f32 %v845_v63 }
 0x36a   :  { %v966_v23 = vor.u32 1.1754944e-38, %v965_v17  ;;  %vm964_vm0 = vcmp.eq.f32.partialorder %v963_v40, 8.507059e+37 }
 0x36b   :  { %1108 = vst [vmem:[#allocation7 + $0x20] sm:$0xff] %v938_v1  ;;  %v942_v2 = vmul.f32 %v1333_v60, %v941_v5 }
 0x36d   :  { %v943_v7 = vadd.f32 %v1333_v60, %v942_v2 }
 0x36e   :  { %v1335_v10 = vpop.eup %1334 }
 0x36f   :  { %v947_v11 = vsel %vm946_vm11, %v1333_v60, %v943_v7  ;;  %v955_v19 = vmul.f32 %v1335_v10, %v845_v63  ;;  %v847_v14 = vpop.xlane.xlu2 %846  ;;  %vm960_vm13 = vweird.f32 %v1335_v10 }
 0x370   :  { %v952_v15 = vsel %vm949_vm12, %v951_v9, %v947_v11  ;;  %1336 = vrcp.f32 %v847_v14  ;;  %vm961_vm15 = vmor %vm959_vm14, %vm960_vm13  ;;  %v980_v32 = vand.u32 2147483648, %v847_v14  ;;  %v978_v34 = vand.u32 2147483647, %v847_v14 }
 0x371   :  { %v953_v29 = vmul.f32 %v1773_v13, %v952_v15  ;;  %v956_v8 = vsub.f32 1.0, %v955_v19  ;;  %vm974_vm2 = vweird.f32 %v847_v14 }
 0x372   :  { %v981_v61 = vor.u32 1.1754944e-38, %v980_v32  ;;  %vm979_vm4 = vcmp.eq.f32.partialorder %v978_v34, 8.507059e+37 }
 0x373   :  { %1109 = vst [vmem:[#allocation7 + $0x28] sm:$0xff] %v953_v29  ;;  %v957_v18 = vmul.f32 %v1335_v10, %v956_v8 }
 0x375   :  { %v958_v22 = vadd.f32 %v1335_v10, %v957_v18 }
 0x376   :  { %v1337_v57 = vpop.eup %1336 }
 0x377   :  { %v962_v46 = vsel %vm961_vm15, %v1335_v10, %v958_v22  ;;  %v970_v25 = vmul.f32 %v1337_v57, %v847_v14  ;;  %v849_v26 = vpop.xlane.xlu0 %848  ;;  %vm975_vm1 = vweird.f32 %v1337_v57 }
 0x378   :  { %v967_v56 = vsel %vm964_vm0, %v966_v23, %v962_v46  ;;  %1338 = vrcp.f32 %v849_v26  ;;  %vm976_vm3 = vmor %vm974_vm2, %vm975_vm1  ;;  %v995_v31 = vand.u32 2147483648, %v849_v26  ;;  %v993_v50 = vand.u32 2147483647, %v849_v26 }
 0x379   :  { %v968_v30 = vmul.f32 %v1777_v16, %v967_v56  ;;  %v971_v13 = vsub.f32 1.0, %v970_v25  ;;  %vm989_vm6 = vweird.f32 %v849_v26 }
 0x37a   :  { %v996_v45 = vor.u32 1.1754944e-38, %v995_v31  ;;  %vm994_vm8 = vcmp.eq.f32.partialorder %v993_v50, 8.507059e+37 }
 0x37b   :  { %1110 = vst [vmem:[#allocation7 + $0x30] sm:$0xff] %v968_v30  ;;  %v972_v3 = vmul.f32 %v1337_v57, %v971_v13 }
 0x37d   :  { %v973_v36 = vadd.f32 %v1337_v57, %v972_v3 }
 0x37e   :  { %v1339_v12 = vpop.eup %1338 }
 0x37f   :  { %v977_v41 = vsel %vm976_vm3, %v1337_v57, %v973_v36  ;;  %v985_v43 = vmul.f32 %v1339_v12, %v849_v26  ;;  %v851_v21 = vpop.xlane.xlu1 %850  ;;  %vm990_vm5 = vweird.f32 %v1339_v12 }
 0x380   :  { %v982_v44 = vsel %vm979_vm4, %v981_v61, %v977_v41  ;;  %1340 = vrcp.f32 %v851_v21  ;;  %vm991_vm7 = vmor %vm989_vm6, %vm990_vm5  ;;  %v1010_v60 = vand.u32 2147483648, %v851_v21  ;;  %v1008_v39 = vand.u32 2147483647, %v851_v21 }
 0x381   :  { %v983_v37 = vmul.f32 %v1781_v20, %v982_v44  ;;  %v986_v16 = vsub.f32 1.0, %v985_v43  ;;  %vm1004_vm10 = vweird.f32 %v851_v21 }
 0x382   :  { %v1011_v58 = vor.u32 1.1754944e-38, %v1010_v60  ;;  %vm1009_vm12 = vcmp.eq.f32.partialorder %v1008_v39, 8.507059e+37 }
 0x383   :  { %1111 = vst [vmem:[#allocation7 + $0x38] sm:$0xff] %v983_v37  ;;  %v987_v48 = vmul.f32 %v1339_v12, %v986_v16 }
 0x385   :  { %v988_v42 = vadd.f32 %v1339_v12, %v987_v48 }
 0x386   :  { %v1341_v52 = vpop.eup %1340 }
 0x387   :  { %v992_v0 = vsel %vm991_vm7, %v1339_v12, %v988_v42  ;;  %v1000_v55 = vmul.f32 %v1341_v52, %v851_v21  ;;  %v853_v27 = vpop.xlane.xlu2 %852  ;;  %vm1005_vm9 = vweird.f32 %v1341_v52 }
 0x388   :  { %v997_v59 = vsel %vm994_vm8, %v996_v45, %v992_v0  ;;  %1342 = vrcp.f32 %v853_v27  ;;  %vm1006_vm11 = vmor %vm1004_vm10, %vm1005_vm9  ;;  %v1025_v7 = vand.u32 2147483648, %v853_v27  ;;  %v1023_v9 = vand.u32 2147483647, %v853_v27 }
 0x389   :  { %v998_v49 = vmul.f32 %v1785_v24, %v997_v59  ;;  %v1001_v20 = vsub.f32 1.0, %v1000_v55  ;;  %vm1019_vm14 = vweird.f32 %v853_v27 }
 0x38a   :  { %v1026_v14 = vor.u32 1.1754944e-38, %v1025_v7  ;;  %vm1024_vm0 = vcmp.eq.f32.partialorder %v1023_v9, 8.507059e+37 }
 0x38b   :  { %1112 = vst [vmem:[#allocation7 + $0x40] sm:$0xff] %v998_v49  ;;  %v1002_v54 = vmul.f32 %v1341_v52, %v1001_v20 }
 0x38d   :  { %v1003_v62 = vadd.f32 %v1341_v52, %v1002_v54 }
 0x38e   :  { %v1343_v63 = vpop.eup %1342 }
 0x38f   :  { %v1007_v1 = vsel %vm1006_vm11, %v1341_v52, %v1003_v62  ;;  %v1015_v5 = vmul.f32 %v1343_v63, %v853_v27  ;;  %v855_v4 = vpop.xlane.xlu0 %854  ;;  %vm1020_vm13 = vweird.f32 %v1343_v63 }
 0x390   :  { %v1012_v2 = vsel %vm1009_vm12, %v1011_v58, %v1007_v1  ;;  %1344 = vrcp.f32 %v855_v4  ;;  %vm1021_vm15 = vmor %vm1019_vm14, %vm1020_vm13  ;;  %v1040_v40 = vand.u32 2147483648, %v855_v4  ;;  %v1038_v57 = vand.u32 2147483647, %v855_v4 }
 0x391   :  { %v1013_v6 = vmul.f32 %v1789_v28, %v1012_v2  ;;  %v1016_v24 = vsub.f32 1.0, %v1015_v5  ;;  %vm1034_vm2 = vweird.f32 %v855_v4 }
 0x392   :  { %v1041_v25 = vor.u32 1.1754944e-38, %v1040_v40  ;;  %vm1039_vm4 = vcmp.eq.f32.partialorder %v1038_v57, 8.507059e+37 }
 0x393   :  { %1113 = vst [vmem:[#allocation7 + $0x48] sm:$0xff] %v1013_v6  ;;  %v1017_v10 = vmul.f32 %v1343_v63, %v1016_v24 }
 0x395   :  { %v1018_v11 = vadd.f32 %v1343_v63, %v1017_v10 }
 0x396   :  { %v1345_v19 = vpop.eup %1344 }
 0x397   :  { %v1022_v15 = vsel %vm1021_vm15, %v1343_v63, %v1018_v11  ;;  %v1030_v29 = vmul.f32 %v1345_v19, %v855_v4  ;;  %v857_v8 = vpop.xlane.xlu1 %856  ;;  %vm1035_vm1 = vweird.f32 %v1345_v19 }
 0x398   :  { %v1027_v17 = vsel %vm1024_vm0, %v1026_v14, %v1022_v15  ;;  %1346 = vrcp.f32 %v857_v8  ;;  %vm1036_vm3 = vmor %vm1034_vm2, %vm1035_vm1  ;;  %v1055_v3 = vand.u32 2147483648, %v857_v8  ;;  %v1053_v36 = vand.u32 2147483647, %v857_v8 }
 0x399   :  { %v1028_v18 = vmul.f32 %v1793_v33, %v1027_v17  ;;  %v1031_v28 = vsub.f32 1.0, %v1030_v29  ;;  %vm1049_vm6 = vweird.f32 %v857_v8 }
 0x39a   :  { %v1056_v41 = vor.u32 1.1754944e-38, %v1055_v3  ;;  %vm1054_vm8 = vcmp.eq.f32.partialorder %v1053_v36, 8.507059e+37 }
 0x39b   :  { %1114 = vst [vmem:[#allocation7 + $0x50] sm:$0xff] %v1028_v18  ;;  %v1032_v22 = vmul.f32 %v1345_v19, %v1031_v28 }
 0x39d   :  { %v1033_v23 = vadd.f32 %v1345_v19, %v1032_v22 }
 0x39e   :  { %v1347_v46 = vpop.eup %1346 }
 0x39f   :  { %v1037_v26 = vsel %vm1036_vm3, %v1345_v19, %v1033_v23  ;;  %v1045_v56 = vmul.f32 %v1347_v46, %v857_v8  ;;  %v859_v30 = vpop.xlane.xlu2 %858  ;;  %vm1050_vm5 = vweird.f32 %v1347_v46 }
 0x3a0   :  { %v1042_v13 = vsel %vm1039_vm4, %v1041_v25, %v1037_v26  ;;  %1348 = vrcp.f32 %v859_v30  ;;  %vm1051_vm7 = vmor %vm1049_vm6, %vm1050_vm5  ;;  %v1070_v31 = vand.u32 2147483648, %v859_v30  ;;  %v1068_v50 = vand.u32 2147483647, %v859_v30 }
 0x3a1   :  { %v1043_v32 = vmul.f32 %v1797_v38, %v1042_v13  ;;  %v1046_v33 = vsub.f32 1.0, %v1045_v56  ;;  %vm1064_vm10 = vweird.f32 %v859_v30 }
 0x3a2   :  { %v1071_v45 = vor.u32 1.1754944e-38, %v1070_v31  ;;  %vm1069_vm12 = vcmp.eq.f32.partialorder %v1068_v50, 8.507059e+37 }
 0x3a3   :  { %1115 = vst [vmem:[#allocation7 + $0x58] sm:$0xff] %v1043_v32  ;;  %v1047_v34 = vmul.f32 %v1347_v46, %v1046_v33 }
 0x3a5   :  { %v1048_v12 = vadd.f32 %v1347_v46, %v1047_v34 }
 0x3a6   :  { %v1349_v61 = vpop.eup %1348 }
 0x3a7   :  { %v1052_v43 = vsel %vm1051_vm7, %v1347_v46, %v1048_v12  ;;  %v1060_v21 = vmul.f32 %v1349_v61, %v859_v30  ;;  %v861_v44 = vpop.xlane.xlu0 %860  ;;  %vm1065_vm9 = vweird.f32 %v1349_v61 }
 0x3a8   :  { %v1057_v37 = vsel %vm1054_vm8, %v1056_v41, %v1052_v43  ;;  %1350 = vrcp.f32 %v861_v44  ;;  %vm1066_vm11 = vmor %vm1064_vm10, %vm1065_vm9  ;;  %v1085_v20 = vand.u32 2147483648, %v861_v44  ;;  %v1083_v54 = vand.u32 2147483647, %v861_v44 }
 0x3a9   :  { %v1058_v16 = vmul.f32 %v1801_v35, %v1057_v37  ;;  %v1061_v38 = vsub.f32 1.0, %v1060_v21  ;;  %vm1079_vm14 = vweird.f32 %v861_v44 }
 0x3aa   :  { %v1086_v63 = vor.u32 1.1754944e-38, %v1085_v20  ;;  %vm1084_vm0 = vcmp.eq.f32.partialorder %v1083_v54, 8.507059e+37 }
 0x3ab   :  { %1116 = vst [vmem:[#allocation7 + $0x60] sm:$0xff] %v1058_v16  ;;  %v1062_v48 = vmul.f32 %v1349_v61, %v1061_v38 }
 0x3ad   :  { %v1063_v42 = vadd.f32 %v1349_v61, %v1062_v48 }
 0x3ae   :  { %v1351_v52 = vpop.eup %1350 }
 0x3af   :  { %v1067_v0 = vsel %vm1066_vm11, %v1349_v61, %v1063_v42  ;;  %v1075_v55 = vmul.f32 %v1351_v52, %v861_v44  ;;  %v863_v27 = vpop.xlane.xlu1 %862  ;;  %vm1080_vm13 = vweird.f32 %v1351_v52 }
 0x3b0   :  { %v1072_v59 = vsel %vm1069_vm12, %v1071_v45, %v1067_v0  ;;  %1352 = vrcp.f32 %v863_v27  ;;  %vm1081_vm15 = vmor %vm1079_vm14, %vm1080_vm13  ;;  %v1100_v6 = vand.u32 2147483648, %v863_v27  ;;  %v1098_v24 = vand.u32 2147483647, %v863_v27 }
 0x3b1   :  { %v1073_v49 = vmul.f32 %v1805_v47, %v1072_v59  ;;  %v1076_v35 = vsub.f32 1.0, %v1075_v55  ;;  %vm1094_vm2 = vweird.f32 %v863_v27 }
 0x3b2   :  { %v1101_v10 = vor.u32 1.1754944e-38, %v1100_v6  ;;  %vm1099_vm4 = vcmp.eq.f32.partialorder %v1098_v24, 8.507059e+37 }
 0x3b3   :  { %1117 = vst [vmem:[#allocation7 + $0x68] sm:$0xff] %v1073_v49  ;;  %v1077_v60 = vmul.f32 %v1351_v52, %v1076_v35 }
 0x3b5   :  { %v1078_v39 = vadd.f32 %v1351_v52, %v1077_v60 }
 0x3b6   :  { %v1353_v62 = vpop.eup %1352 }
 0x3b7   :  { %v1082_v58 = vsel %vm1081_vm15, %v1351_v52, %v1078_v39  ;;  %v1090_v1 = vmul.f32 %v1353_v62, %v863_v27  ;;  %vm1095_vm1 = vweird.f32 %v1353_v62 }
 0x3b8   :  { %v1087_v5 = vsel %vm1084_vm0, %v1086_v63, %v1082_v58  ;;  %vm1096_vm3 = vmor %vm1094_vm2, %vm1095_vm1 }
 0x3b9   :  { %v1088_v4 = vmul.f32 %v1809_v51, %v1087_v5  ;;  %v1091_v2 = vsub.f32 1.0, %v1090_v1 }
 0x3bb   :  { %1118 = vst [vmem:[#allocation7 + $0x70] sm:$0xff] %v1088_v4  ;;  %v1092_v47 = vmul.f32 %v1353_v62, %v1091_v2 }
 0x3bd   :  { %v1093_v7 = vadd.f32 %v1353_v62, %v1092_v47 }
 0x3bf   :  { %v1097_v9 = vsel %vm1096_vm3, %v1353_v62, %v1093_v7 }
 0x3c0   :  { %v1102_v11 = vsel %vm1099_vm4, %v1101_v10, %v1097_v9 }
 0x3c1   :  { %v1103_v51 = vmul.f32 %v1812_v53, %v1102_v11 }
 0x3c3   :  { %1119 = vst [vmem:[#allocation7 + $0x78] sm:$0xff] %v1103_v51 }
 0x3c4   :  { %1132 = dma.vmem_to_hbm [thread:$0]  %s1125_s3, 2048, %s1127_s30, [#allocation4], %s1438_s11, %s1438_s11, %s1439_s12  }
 0x3c5   :  { %1430 = dma.done.wait [#allocation4], 2048  }
 0x3c6   :  { %1431 = vsyncadd [#allocation4], 4294965248 }
 0x3c7   :  { %1137 = vsyncpa [#allocation3], 1 }
 0x3c8   :  { %1138 = vsyncpa [#allocation6], 1 }
 0x3c9   :  { %1139 = vsyncpa [#allocation4], 1 }

// kernel: tpu_custom_call.1
= control target key start
LH: loop header
LB: loop body
LE: loop exit
PB: predicated region body
PF: predicated region fallthrough
CT: control target
= control target key end

     0   :  { %15 = vsyncpa [#allocation3], 0  ;;  %s1834_s0 = inlined_call_operand.vmem [shape: f32[128,32], index: 0, kind: input, shape index: {}]   ;;  %s1835_s1 = inlined_call_operand.vmem [shape: s8[128,128], index: 1, kind: input, shape index: {}]   ;;  %s1836_s2 = inlined_call_operand.hbm [shape: bf16[32,128], index: 2, kind: input, shape index: {}]   ;;  %s1837_s3 = inlined_call_operand.vmem [shape: f32[1,128], index: 3, kind: input, shape index: {}]   ;;  %s1838_s4 = inlined_call_operand.vmem [shape: bf16[128,128], index: 4, kind: input, shape index: {}]   ;;  %s1839_s5 = inlined_call_operand.vmem [shape: f32[1,128], index: 5, kind: input, shape index: {}]   ;;  %s1840_s6 = inlined_call_operand.vmem [shape: bf16[128,128], index: 6, kind: input, shape index: {}]   ;;  %s1841_s7 = inlined_call_operand.vmem [shape: f32[1,128], index: 7, kind: input, shape index: {}]   ;;  %s1842_s8 = inlined_call_operand.hbm [shape: bf16[128,128], index: 8, kind: input, shape index: {}]   ;;  %s1843_s9 = inlined_call_operand.vmem [shape: f32[1,128], index: 9, kind: input, shape index: {}]   ;;  %s1844_s10 = inlined_call_operand.hbm [shape: f32[128,128], index: 10, kind: output, shape index: {}]  }
   0x1   :  { %16 = vsyncpa [#allocation6], 0 }
   0x2   :  { %17 = vsyncpa [#allocation4], 0  ;;  %s26_s15 = sshll.u32 %s1836_s2, 4  ;;  %s1432_s16 = smov [#allocation2]   ;;  %s27_s15 = int_to_ptr.hbm [resolvable:$true] %s26_s15 }
   0x3   :  { %s28_s17 = sshll.u32 %s1432_s16, 4  ;;  %s49_s20 = sshll.u32 %s1842_s8, 4  ;;  %s29_s17 = int_to_ptr.vmem [resolvable:$true] %s28_s17  ;;  %s50_s20 = int_to_ptr.hbm [resolvable:$true] %s49_s20 }
   0x4   :  { %s1433_s21 = smov 64   ;;  %s1434_s22 = smov 4  }
   0x5   :  { %34 = dma.hbm_to_vmem [thread:$0]  %s27_s15, 256, %s29_s17, [#allocation3], %s1433_s21, %s1433_s21, %s1434_s22  }
   0x6   :  { %s1435_s23 = smov [#allocation5]  }
   0x7   :  { %s51_s24 = sshll.u32 %s1435_s23, 4  ;;  %s52_s24 = int_to_ptr.vmem [resolvable:$true] %s51_s24 }
   0x8   :  { %57 = dma.hbm_to_vmem [thread:$0]  %s50_s20, 1024, %s52_s24, [#allocation6], %s1433_s21, %s1433_s21, %s1434_s22  }
   0x9   :  { %1426 = dma.done.wait [#allocation3], 256  }
   0xa   :  { %1427 = vsyncadd [#allocation3], 4294967040 }
   0xb   :  { %1428 = dma.done.wait [#allocation6], 1024  }
   0xc   :  { %1429 = vsyncadd [#allocation6], 4294966272  ;;  %v1253_v0 = vld [vmem:[#allocation2 + $0x8] sm:$0xff]  ;;  %v1252_v1 = vld [vmem:[#allocation2] sm:$0xff]  ;;  %vm115_vm0 = vcmask 261120   ;;  %s1126_s30 = sshll.u32 %s1844_s10, 4  ;;  %s1127_s30 = int_to_ptr.hbm [resolvable:$true] %s1126_s30 }
   0xd   :  { %146 = vmatpush.bf16.msra.mxu0 %v1253_v0  ;;  %v71_v2 = vld [vmem:[%s1834_s0] sm:$0xff]  ;;  %v72_v3 = vld [vmem:[%s1834_s0 + $0x8] sm:$0xff]  ;;  %v73_v5 = vld [vmem:[%s1834_s0 + $0x10] sm:$0xff]  ;;  %s1438_s11 = smov 128   ;;  %s1439_s12 = smov 8  }
   0xe   :  { %v87_v4 = vpack.c.bf16 %v72_v3, %v71_v2  ;;  %v74_v6 = vld [vmem:[%s1834_s0 + $0x18] sm:$0xff]  ;;  %v75_v8 = vld [vmem:[%s1834_s0 + $0x20] sm:$0xff]  ;;  %v76_v9 = vld [vmem:[%s1834_s0 + $0x28] sm:$0xff] }
   0xf   :  { %v88_v7 = vpack.c.bf16 %v74_v6, %v73_v5  ;;  %v89_v10 = vpack.c.bf16 %v76_v9, %v75_v8  ;;  %v77_v11 = vld [vmem:[%s1834_s0 + $0x30] sm:$0xff]  ;;  %v78_v12 = vld [vmem:[%s1834_s0 + $0x38] sm:$0xff]  ;;  %v79_v14 = vld [vmem:[%s1834_s0 + $0x40] sm:$0xff] }
  0x10   :  { %v90_v13 = vpack.c.bf16 %v78_v12, %v77_v11  ;;  %v80_v15 = vld [vmem:[%s1834_s0 + $0x48] sm:$0xff]  ;;  %v1261_v17 = vld [vmem:[%s1838_s4 + $0x38] sm:$0xff]  ;;  %v81_v18 = vld [vmem:[%s1834_s0 + $0x50] sm:$0xff] }
  0x11   :  { %147 = vmatpush.bf16.msra.mxu0 %v1252_v1  ;;  %v91_v16 = vpack.c.bf16 %v80_v15, %v79_v14  ;;  %281 = vmatpush.bf16.msra.mxu1 %v1261_v17  ;;  %v82_v19 = vld [vmem:[%s1834_s0 + $0x58] sm:$0xff]  ;;  %v1260_v21 = vld [vmem:[%s1838_s4 + $0x30] sm:$0xff]  ;;  %v1259_v22 = vld [vmem:[%s1838_s4 + $0x28] sm:$0xff] }
  0x12   :  { %v92_v20 = vpack.c.bf16 %v82_v19, %v81_v18  ;;  %v1258_v23 = vld [vmem:[%s1838_s4 + $0x20] sm:$0xff]  ;;  %v84_v25 = vld [vmem:[%s1834_s0 + $0x68] sm:$0xff]  ;;  %v1257_v26 = vld [vmem:[%s1838_s4 + $0x18] sm:$0xff] }
  0x13   :  { %v83_v24 = vld [vmem:[%s1834_s0 + $0x60] sm:$0xff]  ;;  %v1256_v28 = vld [vmem:[%s1838_s4 + $0x10] sm:$0xff]  ;;  %v1255_v29 = vld [vmem:[%s1838_s4 + $0x8] sm:$0xff] }
  0x14   :  { %1148 = vmatmul.msk.bf16.vlgmr.msra.gmra.mxu0 %vm115_vm0, %v87_v4  ;;  %v93_v27 = vpack.c.bf16 %v84_v25, %v83_v24  ;;  %v1254_v30 = vld [vmem:[%s1838_s4] sm:$0xff]  ;;  %v85_v31 = vld [vmem:[%s1834_s0 + $0x70] sm:$0xff]  ;;  %v86_v32 = vld [vmem:[%s1834_s0 + $0x78] sm:$0xff] }
  0x15   :  { %282 = vmatpush.bf16.msra.mxu1 %v1260_v21  ;;  %v94_v33 = vpack.c.bf16 %v86_v32, %v85_v31  ;;  %v1584_v35 = vld [vmem:[%s1837_s3] ss:$0 sm:$0xff]  ;;  %v1268_v14 = vld [vmem:[%s1840_s6 + $0x30] sm:$0xff]  ;;  %v1265_v21 = vld [vmem:[%s1840_s6 + $0x18] sm:$0xff] }
  0x16   :  { %v1266_v17 = vld [vmem:[%s1840_s6 + $0x20] sm:$0xff]  ;;  %v1264_v25 = vld [vmem:[%s1840_s6 + $0x10] sm:$0xff] }
  0x19   :  { %283 = vmatpush.bf16.msra.mxu1 %v1259_v22 }
  0x1d   :  { %284 = vmatpush.bf16.msra.mxu1 %v1258_v23 }
  0x21   :  { %285 = vmatpush.bf16.msra.mxu1 %v1257_v26 }
  0x24   :  { %1149 = vmatmul.msk.bf16.gmra.mxu0 %vm115_vm0, %v88_v7 }
  0x25   :  { %286 = vmatpush.bf16.msra.mxu1 %v1256_v28  ;;  %v1262_v28 = vld [vmem:[%s1840_s6] sm:$0xff] }
  0x29   :  { %287 = vmatpush.bf16.msra.mxu1 %v1255_v29 }
  0x2d   :  { %288 = vmatpush.bf16.msra.mxu1 %v1254_v30 }
  0x34   :  { %1150 = vmatmul.msk.bf16.gmra.mxu0 %vm115_vm0, %v89_v10  ;;  %v1269_v10 = vld [vmem:[%s1840_s6 + $0x38] sm:$0xff] }
  0x35   :  { %422 = vmatpush.bf16.msra.mxu2 %v1269_v10 }
  0x39   :  { %423 = vmatpush.bf16.msra.mxu2 %v1268_v14  ;;  %v1277_v14 = vld [vmem:[#allocation5 + $0x38] sm:$0xff] }
  0x3a   :  { %563 = vmatpush.bf16.msra.mxu3 %v1277_v14 }
  0x44   :  { %1151 = vmatmul.msk.bf16.gmra.mxu0 %vm115_vm0, %v90_v13 }
  0x54   :  { %1152 = vmatmul.msk.bf16.gmra.mxu0 %vm115_vm0, %v91_v16  ;;  %v1267_v16 = vld [vmem:[%s1840_s6 + $0x28] sm:$0xff] }
  0x55   :  { %424 = vmatpush.bf16.msra.mxu2 %v1267_v16  ;;  %v1276_v16 = vld [vmem:[#allocation5 + $0x30] sm:$0xff] }
  0x56   :  { %564 = vmatpush.bf16.msra.mxu3 %v1276_v16 }
  0x59   :  { %425 = vmatpush.bf16.msra.mxu2 %v1266_v17  ;;  %v1275_v17 = vld [vmem:[#allocation5 + $0x28] sm:$0xff] }
  0x5a   :  { %565 = vmatpush.bf16.msra.mxu3 %v1275_v17 }
  0x5d   :  { %426 = vmatpush.bf16.msra.mxu2 %v1265_v21  ;;  %v1274_v21 = vld [vmem:[#allocation5 + $0x20] sm:$0xff] }
  0x5e   :  { %566 = vmatpush.bf16.msra.mxu3 %v1274_v21 }
  0x61   :  { %427 = vmatpush.bf16.msra.mxu2 %v1264_v25 }
  0x64   :  { %1153 = vmatmul.msk.bf16.gmra.mxu0 %vm115_vm0, %v92_v20 }
  0x74   :  { %1154 = vmatmul.msk.bf16.gmra.mxu0 %vm115_vm0, %v93_v27  ;;  %v1263_v27 = vld [vmem:[%s1840_s6 + $0x8] sm:$0xff] }
  0x75   :  { %428 = vmatpush.bf16.msra.mxu2 %v1263_v27  ;;  %v1272_v27 = vld [vmem:[#allocation5 + $0x10] sm:$0xff] }
  0x79   :  { %429 = vmatpush.bf16.msra.mxu2 %v1262_v28 }
  0x84   :  { %1155 = vmatmul.msk.bf16.gmra.mxu0 %vm115_vm0, %v94_v33 }
  0x91   :  { %v149_v34 = vpop.f32.mrf.mxu0 }
  0x92   :  { %v150_v36 = vadd.f32 %v1584_v35, %v149_v34 }
  0x94   :  { %v189_v39 = vmax.f32 %v150_v36, 0.0 }
  0x99   :  { %v151_v37 = vpop.f32.mrf.mxu0 }
  0x9a   :  { %v152_v38 = vadd.f32 %v1584_v35, %v151_v37  ;;  %v1629_v37 = vld [vmem:[%s1839_s5] ss:$0 sm:$0xff] }
  0x9c   :  { %v190_v40 = vmax.f32 %v152_v38, 0.0 }
  0x9e   :  { %v205_v41 = vpack.c.bf16 %v190_v40, %v189_v39 }
  0xa0   :  { %289 = vmatmul.bf16.vlgmr.msra.gmra.mxu1 %v205_v41 }
  0xa1   :  { %v154_v42 = vpop.f32.mrf.mxu0 }
  0xa2   :  { %v155_v43 = vadd.f32 %v1584_v35, %v154_v42 }
  0xa4   :  { %v191_v46 = vmax.f32 %v155_v43, 0.0 }
  0xa9   :  { %v156_v44 = vpop.f32.mrf.mxu0 }
  0xaa   :  { %v157_v45 = vadd.f32 %v1584_v35, %v156_v44 }
  0xac   :  { %v192_v47 = vmax.f32 %v157_v45, 0.0 }
  0xae   :  { %v206_v48 = vpack.c.bf16 %v192_v47, %v191_v46 }
  0xb0   :  { %294 = vmatmul.bf16.gmra.mxu1 %v206_v48 }
  0xb1   :  { %v159_v49 = vpop.f32.mrf.mxu0 }
  0xb2   :  { %v160_v50 = vadd.f32 %v1584_v35, %v159_v49 }
  0xb4   :  { %v193_v53 = vmax.f32 %v160_v50, 0.0 }
  0xb9   :  { %v161_v51 = vpop.f32.mrf.mxu0 }
  0xba   :  { %v162_v52 = vadd.f32 %v1584_v35, %v161_v51 }
  0xbc   :  { %v194_v54 = vmax.f32 %v162_v52, 0.0 }
  0xbe   :  { %v207_v55 = vpack.c.bf16 %v194_v54, %v193_v53 }
  0xc0   :  { %299 = vmatmul.bf16.gmra.mxu1 %v207_v55 }
  0xc1   :  { %v164_v56 = vpop.f32.mrf.mxu0 }
  0xc2   :  { %v165_v57 = vadd.f32 %v1584_v35, %v164_v56 }
  0xc4   :  { %v195_v60 = vmax.f32 %v165_v57, 0.0 }
  0xc9   :  { %v166_v58 = vpop.f32.mrf.mxu0 }
  0xca   :  { %v167_v59 = vadd.f32 %v1584_v35, %v166_v58 }
  0xcc   :  { %v196_v61 = vmax.f32 %v167_v59, 0.0 }
  0xce   :  { %v208_v62 = vpack.c.bf16 %v196_v61, %v195_v60 }
  0xd0   :  { %304 = vmatmul.bf16.gmra.mxu1 %v208_v62 }
  0xd1   :  { %v169_v63 = vpop.f32.mrf.mxu0 }
  0xd2   :  { %v170_v0 = vadd.f32 %v1584_v35, %v169_v63 }
  0xd4   :  { %v197_v3 = vmax.f32 %v170_v0, 0.0 }
  0xd9   :  { %v171_v1 = vpop.f32.mrf.mxu0 }
  0xda   :  { %v172_v2 = vadd.f32 %v1584_v35, %v171_v1 }
  0xdc   :  { %v198_v4 = vmax.f32 %v172_v2, 0.0 }
  0xde   :  { %v209_v5 = vpack.c.bf16 %v198_v4, %v197_v3 }
  0xe0   :  { %309 = vmatmul.bf16.gmra.mxu1 %v209_v5 }
  0xe1   :  { %v174_v6 = vpop.f32.mrf.mxu0 }
  0xe2   :  { %v175_v7 = vadd.f32 %v1584_v35, %v174_v6 }
  0xe4   :  { %v199_v11 = vmax.f32 %v175_v7, 0.0 }
  0xe9   :  { %v176_v8 = vpop.f32.mrf.mxu0 }
  0xea   :  { %v177_v9 = vadd.f32 %v1584_v35, %v176_v8 }
  0xec   :  { %v200_v12 = vmax.f32 %v177_v9, 0.0 }
  0xee   :  { %v210_v13 = vpack.c.bf16 %v200_v12, %v199_v11 }
  0xf0   :  { %314 = vmatmul.bf16.gmra.mxu1 %v210_v13 }
  0xf1   :  { %v179_v15 = vpop.f32.mrf.mxu0 }
  0xf2   :  { %v180_v18 = vadd.f32 %v1584_v35, %v179_v15 }
  0xf4   :  { %v201_v22 = vmax.f32 %v180_v18, 0.0 }
  0xf9   :  { %v181_v19 = vpop.f32.mrf.mxu0 }
  0xfa   :  { %v182_v20 = vadd.f32 %v1584_v35, %v181_v19 }
  0xfc   :  { %v202_v23 = vmax.f32 %v182_v20, 0.0 }
  0xfe   :  { %v211_v24 = vpack.c.bf16 %v202_v23, %v201_v22 }
 0x100   :  { %319 = vmatmul.bf16.gmra.mxu1 %v211_v24 }
 0x101   :  { %v184_v26 = vpop.f32.mrf.mxu0 }
 0x102   :  { %v185_v29 = vadd.f32 %v1584_v35, %v184_v26  ;;  %v1273_v26 = vld [vmem:[#allocation5 + $0x18] sm:$0xff] }
 0x103   :  { %567 = vmatpush.bf16.msra.mxu3 %v1273_v26 }
 0x104   :  { %v203_v32 = vmax.f32 %v185_v29, 0.0 }
 0x107   :  { %568 = vmatpush.bf16.msra.mxu3 %v1272_v27  ;;  %v1436_v27 = vmov 0  }
 0x109   :  { %v186_v30 = vpop.f32.mrf.mxu0 }
 0x10a   :  { %v187_v31 = vadd.f32 %v1584_v35, %v186_v30  ;;  %v1271_v30 = vld [vmem:[#allocation5 + $0x8] sm:$0xff] }
 0x10b   :  { %569 = vmatpush.bf16.msra.mxu3 %v1271_v30 }
 0x10c   :  { %v204_v33 = vmax.f32 %v187_v31, 0.0 }
 0x10e   :  { %v212_v34 = vpack.c.bf16 %v204_v33, %v203_v32 }
 0x110   :  { %324 = vmatmul.bf16.gmra.mxu1 %v212_v34  ;;  %v1270_v34 = vld [vmem:[#allocation5] sm:$0xff] }
 0x111   :  { %570 = vmatpush.bf16.msra.mxu3 %v1270_v34 }
 0x11d   :  { %v290_v36 = vpop.f32.mrf.mxu1 }
 0x11e   :  { %v291_v38 = vadd.f32 %v1629_v37, %v290_v36 }
 0x120   :  { %v330_v41 = vmax.f32 %v291_v38, 0.0 }
 0x125   :  { %v292_v39 = vpop.f32.mrf.mxu1 }
 0x126   :  { %v293_v40 = vadd.f32 %v1629_v37, %v292_v39  ;;  %v1288_v39 = vld [vmem:[%s1841_s7] ss:$0 sm:$0xff] }
 0x128   :  { %v331_v42 = vmax.f32 %v293_v40, 0.0 }
 0x12a   :  { %v346_v43 = vpack.c.bf16 %v331_v42, %v330_v41 }
 0x12c   :  { %430 = vmatmul.bf16.vlgmr.msra.gmra.mxu2 %v346_v43 }
 0x12d   :  { %v295_v35 = vpop.f32.mrf.mxu1 }
 0x12e   :  { %v296_v44 = vadd.f32 %v1629_v37, %v295_v35 }
 0x130   :  { %v332_v47 = vmax.f32 %v296_v44, 0.0 }
 0x135   :  { %v297_v45 = vpop.f32.mrf.mxu1 }
 0x136   :  { %v298_v46 = vadd.f32 %v1629_v37, %v297_v45 }
 0x138   :  { %v333_v48 = vmax.f32 %v298_v46, 0.0 }
 0x13a   :  { %v347_v49 = vpack.c.bf16 %v333_v48, %v332_v47 }
 0x13c   :  { %435 = vmatmul.bf16.gmra.mxu2 %v347_v49 }
 0x13d   :  { %v300_v50 = vpop.f32.mrf.mxu1 }
 0x13e   :  { %v301_v51 = vadd.f32 %v1629_v37, %v300_v50 }
 0x140   :  { %v334_v54 = vmax.f32 %v301_v51, 0.0 }
 0x145   :  { %v302_v52 = vpop.f32.mrf.mxu1 }
 0x146   :  { %v303_v53 = vadd.f32 %v1629_v37, %v302_v52 }
 0x148   :  { %v335_v55 = vmax.f32 %v303_v53, 0.0 }
 0x14a   :  { %v348_v56 = vpack.c.bf16 %v335_v55, %v334_v54 }
 0x14c   :  { %440 = vmatmul.bf16.gmra.mxu2 %v348_v56 }
 0x14d   :  { %v305_v57 = vpop.f32.mrf.mxu1 }
 0x14e   :  { %v306_v58 = vadd.f32 %v1629_v37, %v305_v57 }
 0x150   :  { %v336_v61 = vmax.f32 %v306_v58, 0.0 }
 0x155   :  { %v307_v59 = vpop.f32.mrf.mxu1 }
 0x156   :  { %v308_v60 = vadd.f32 %v1629_v37, %v307_v59 }
 0x158   :  { %v337_v62 = vmax.f32 %v308_v60, 0.0 }
 0x15a   :  { %v349_v63 = vpack.c.bf16 %v337_v62, %v336_v61 }
 0x15c   :  { %445 = vmatmul.bf16.gmra.mxu2 %v349_v63 }
 0x15d   :  { %v310_v0 = vpop.f32.mrf.mxu1 }
 0x15e   :  { %v311_v1 = vadd.f32 %v1629_v37, %v310_v0 }
 0x160   :  { %v338_v4 = vmax.f32 %v311_v1, 0.0 }
 0x165   :  { %v312_v2 = vpop.f32.mrf.mxu1 }
 0x166   :  { %v313_v3 = vadd.f32 %v1629_v37, %v312_v2 }
 0x168   :  { %v339_v5 = vmax.f32 %v313_v3, 0.0 }
 0x16a   :  { %v350_v6 = vpack.c.bf16 %v339_v5, %v338_v4 }
 0x16c   :  { %450 = vmatmul.bf16.gmra.mxu2 %v350_v6 }
 0x16d   :  { %v315_v7 = vpop.f32.mrf.mxu1 }
 0x16e   :  { %v316_v8 = vadd.f32 %v1629_v37, %v315_v7 }
 0x170   :  { %v340_v11 = vmax.f32 %v316_v8, 0.0 }
 0x175   :  { %v317_v9 = vpop.f32.mrf.mxu1 }
 0x176   :  { %v318_v10 = vadd.f32 %v1629_v37, %v317_v9 }
 0x178   :  { %v341_v12 = vmax.f32 %v318_v10, 0.0 }
 0x17a   :  { %v351_v13 = vpack.c.bf16 %v341_v12, %v340_v11 }
 0x17c   :  { %455 = vmatmul.bf16.gmra.mxu2 %v351_v13 }
 0x17d   :  { %v320_v15 = vpop.f32.mrf.mxu1 }
 0x17e   :  { %v321_v18 = vadd.f32 %v1629_v37, %v320_v15 }
 0x180   :  { %v342_v22 = vmax.f32 %v321_v18, 0.0 }
 0x185   :  { %v322_v19 = vpop.f32.mrf.mxu1 }
 0x186   :  { %v323_v20 = vadd.f32 %v1629_v37, %v322_v19 }
 0x188   :  { %v343_v23 = vmax.f32 %v323_v20, 0.0 }
 0x18a   :  { %v352_v24 = vpack.c.bf16 %v343_v23, %v342_v22  ;;  %v612_v23 = vld [vmem:[%s1835_s1] sm:$0xff] }
 0x18b   :  { %vm616_vm1 = vnez %v612_v23 }
 0x18c   :  { %460 = vmatmul.bf16.gmra.mxu2 %v352_v24 }
 0x18d   :  { %v325_v25 = vpop.f32.mrf.mxu1 }
 0x18e   :  { %v326_v28 = vadd.f32 %v1629_v37, %v325_v25 }
 0x190   :  { %v344_v32 = vmax.f32 %v326_v28, 0.0  ;;  %v620_v28 = vsel %vm616_vm1, 16843009, %v1436_v27 }
 0x195   :  { %v327_v29 = vpop.f32.mrf.mxu1 }
 0x196   :  { %v328_v31 = vadd.f32 %v1629_v37, %v327_v29 }
 0x198   :  { %v345_v33 = vmax.f32 %v328_v31, 0.0  ;;  %v624_v31 = vunpack.c.0.s8 %v620_v28 }
 0x19a   :  { %v353_v36 = vpack.c.bf16 %v345_v33, %v344_v32  ;;  %v640_v33 = vpack.c.b16 %v624_v31, %v624_v31 }
 0x19c   :  { %465 = vmatmul.bf16.gmra.mxu2 %v353_v36  ;;  %v641_v34 = vpack.c.b8 %v640_v33, %v640_v33  ;;  %v625_v36 = vunpack.c.1.s8 %v620_v28 }
 0x19e   :  { %vm672_vm2 = vnez %v641_v34 }
 0x1af   :  { %v431_v38 = vpop.f32.mrf.mxu2 }
 0x1b0   :  { %v432_v40 = vadd.f32 %v1288_v39, %v431_v38  ;;  %v642_v38 = vpack.c.b16 %v625_v36, %v625_v36 }
 0x1b2   :  { %v471_v43 = vmax.f32 %v432_v40, 0.0  ;;  %v688_v40 = vsel %vm672_vm2, 16843009, %v1436_v27 }
 0x1b7   :  { %v433_v41 = vpop.f32.mrf.mxu2 }
 0x1b8   :  { %v434_v42 = vadd.f32 %v1288_v39, %v433_v41  ;;  %v643_v41 = vpack.c.b8 %v642_v38, %v642_v38 }
 0x1ba   :  { %v472_v35 = vmax.f32 %v434_v42, 0.0  ;;  %v626_v42 = vunpack.c.2.s8 %v620_v28  ;;  %vm673_vm3 = vnez %v643_v41 }
 0x1bc   :  { %v487_v44 = vpack.c.bf16 %v472_v35, %v471_v43  ;;  %v704_v43 = vunpack.c.0.s8 %v688_v40  ;;  %v644_v35 = vpack.c.b16 %v626_v42, %v626_v42 }
 0x1be   :  { %571 = vmatmul.bf16.vlgmr.msra.gmra.mxu3 %v487_v44  ;;  %vm720_vm4 = vcmp.ne.s32.totalorder %v704_v43, 0 }
 0x1bf   :  { %v436_v37 = vpop.f32.mrf.mxu2 }
 0x1c0   :  { %v437_v45 = vadd.f32 %v1288_v39, %v436_v37 }
 0x1c2   :  { %v473_v48 = vmax.f32 %v437_v45, 0.0  ;;  %v689_v45 = vsel %vm673_vm3, 16843009, %v1436_v27 }
 0x1c7   :  { %v438_v46 = vpop.f32.mrf.mxu2 }
 0x1c8   :  { %v439_v47 = vadd.f32 %v1288_v39, %v438_v46  ;;  %v613_v46 = vld [vmem:[%s1835_s1 + $0x8] sm:$0xff] }
 0x1c9   :  { %vm617_vm5 = vnez %v613_v46 }
 0x1ca   :  { %v474_v49 = vmax.f32 %v439_v47, 0.0  ;;  %v645_v47 = vpack.c.b8 %v644_v35, %v644_v35 }
 0x1cc   :  { %v488_v50 = vpack.c.bf16 %v474_v49, %v473_v48  ;;  %v627_v48 = vunpack.c.3.s8 %v620_v28  ;;  %vm674_vm6 = vnez %v645_v47 }
 0x1ce   :  { %576 = vmatmul.bf16.gmra.mxu3 %v488_v50  ;;  %v705_v50 = vunpack.c.0.s8 %v689_v45 }
 0x1cf   :  { %v441_v51 = vpop.f32.mrf.mxu2 }
 0x1d0   :  { %v442_v52 = vadd.f32 %v1288_v39, %v441_v51  ;;  %v646_v51 = vpack.c.b16 %v627_v48, %v627_v48  ;;  %vm721_vm7 = vcmp.ne.s32.totalorder %v705_v50, 0 }
 0x1d2   :  { %v475_v55 = vmax.f32 %v442_v52, 0.0  ;;  %v621_v52 = vsel %vm617_vm5, 16843009, %v1436_v27 }
 0x1d7   :  { %v443_v53 = vpop.f32.mrf.mxu2 }
 0x1d8   :  { %v444_v54 = vadd.f32 %v1288_v39, %v443_v53 }
 0x1da   :  { %v476_v56 = vmax.f32 %v444_v54, 0.0 }
 0x1dc   :  { %v489_v57 = vpack.c.bf16 %v476_v56, %v475_v55  ;;  %v690_v55 = vsel %vm674_vm6, 16843009, %v1436_v27  ;;  %v647_v56 = vpack.c.b8 %v646_v51, %v646_v51 }
 0x1de   :  { %581 = vmatmul.bf16.gmra.mxu3 %v489_v57  ;;  %v628_v57 = vunpack.c.0.s8 %v621_v52  ;;  %vm675_vm8 = vnez %v647_v56 }
 0x1df   :  { %v446_v58 = vpop.f32.mrf.mxu2 }
 0x1e0   :  { %v447_v59 = vadd.f32 %v1288_v39, %v446_v58 }
 0x1e2   :  { %v477_v62 = vmax.f32 %v447_v59, 0.0  ;;  %v706_v59 = vunpack.c.0.s8 %v690_v55 }
 0x1e4   :  { %vm722_vm9 = vcmp.ne.s32.totalorder %v706_v59, 0 }
 0x1e7   :  { %v448_v60 = vpop.f32.mrf.mxu2 }
 0x1e8   :  { %v449_v61 = vadd.f32 %v1288_v39, %v448_v60  ;;  %v648_v60 = vpack.c.b16 %v628_v57, %v628_v57 }
 0x1ea   :  { %v478_v63 = vmax.f32 %v449_v61, 0.0 }
 0x1ec   :  { %v490_v0 = vpack.c.bf16 %v478_v63, %v477_v62  ;;  %v691_v63 = vsel %vm675_vm8, 16843009, %v1436_v27 }
 0x1ee   :  { %586 = vmatmul.bf16.gmra.mxu3 %v490_v0  ;;  %v649_v0 = vpack.c.b8 %v648_v60, %v648_v60 }
 0x1ef   :  { %v451_v1 = vpop.f32.mrf.mxu2 }
 0x1f0   :  { %v452_v2 = vadd.f32 %v1288_v39, %v451_v1  ;;  %v629_v1 = vunpack.c.1.s8 %v621_v52  ;;  %vm676_vm10 = vnez %v649_v0 }
 0x1f2   :  { %v479_v5 = vmax.f32 %v452_v2, 0.0 }
 0x1f7   :  { %v453_v3 = vpop.f32.mrf.mxu2 }
 0x1f8   :  { %v454_v4 = vadd.f32 %v1288_v39, %v453_v3  ;;  %v707_v3 = vunpack.c.0.s8 %v691_v63 }
 0x1fa   :  { %v480_v6 = vmax.f32 %v454_v4, 0.0  ;;  %v650_v4 = vpack.c.b16 %v629_v1, %v629_v1  ;;  %vm723_vm11 = vcmp.ne.s32.totalorder %v707_v3, 0 }
 0x1fc   :  { %v491_v7 = vpack.c.bf16 %v480_v6, %v479_v5 }
 0x1fe   :  { %591 = vmatmul.bf16.gmra.mxu3 %v491_v7  ;;  %v692_v7 = vsel %vm676_vm10, 16843009, %v1436_v27 }
 0x1ff   :  { %v456_v8 = vpop.f32.mrf.mxu2 }
 0x200   :  { %v457_v9 = vadd.f32 %v1288_v39, %v456_v8  ;;  %v651_v8 = vpack.c.b8 %v650_v4, %v650_v4 }
 0x202   :  { %v481_v12 = vmax.f32 %v457_v9, 0.0  ;;  %v630_v9 = vunpack.c.2.s8 %v621_v52  ;;  %vm677_vm12 = vnez %v651_v8 }
 0x207   :  { %v458_v10 = vpop.f32.mrf.mxu2 }
 0x208   :  { %v459_v11 = vadd.f32 %v1288_v39, %v458_v10 }
 0x20a   :  { %v482_v13 = vmax.f32 %v459_v11, 0.0  ;;  %v708_v11 = vunpack.c.0.s8 %v692_v7 }
 0x20c   :  { %v492_v14 = vpack.c.bf16 %v482_v13, %v481_v12  ;;  %v652_v12 = vpack.c.b16 %v630_v9, %v630_v9  ;;  %vm724_vm13 = vcmp.ne.s32.totalorder %v708_v11, 0 }
 0x20e   :  { %596 = vmatmul.bf16.gmra.mxu3 %v492_v14 }
 0x20f   :  { %v461_v15 = vpop.f32.mrf.mxu2 }
 0x210   :  { %v462_v16 = vadd.f32 %v1288_v39, %v461_v15  ;;  %v693_v15 = vsel %vm677_vm12, 16843009, %v1436_v27 }
 0x212   :  { %v483_v19 = vmax.f32 %v462_v16, 0.0  ;;  %v614_v16 = vld [vmem:[%s1835_s1 + $0x10] sm:$0xff] }
 0x213   :  { %vm618_vm14 = vnez %v614_v16 }
 0x217   :  { %v463_v17 = vpop.f32.mrf.mxu2 }
 0x218   :  { %v464_v18 = vadd.f32 %v1288_v39, %v463_v17  ;;  %v653_v17 = vpack.c.b8 %v652_v12, %v652_v12 }
 0x21a   :  { %v484_v20 = vmax.f32 %v464_v18, 0.0  ;;  %v631_v18 = vunpack.c.3.s8 %v621_v52  ;;  %vm678_vm15 = vnez %v653_v17 }
 0x21c   :  { %v493_v21 = vpack.c.bf16 %v484_v20, %v483_v19  ;;  %v709_v20 = vunpack.c.0.s8 %v693_v15 }
 0x21e   :  { %601 = vmatmul.bf16.gmra.mxu3 %v493_v21  ;;  %v654_v21 = vpack.c.b16 %v631_v18, %v631_v18  ;;  %vm725_vm0 = vcmp.ne.s32.totalorder %v709_v20, 0 }
 0x21f   :  { %v466_v22 = vpop.f32.mrf.mxu2 }
 0x220   :  { %v467_v24 = vadd.f32 %v1288_v39, %v466_v22  ;;  %v622_v22 = vsel %vm618_vm14, 16843009, %v1436_v27 }
 0x221   :  { %v632_v28 = vunpack.c.0.s8 %v622_v22  ;;  %v633_v38 = vunpack.c.1.s8 %v622_v22  ;;  %v634_v45 = vunpack.c.2.s8 %v622_v22  ;;  %v635_v55 = vunpack.c.3.s8 %v622_v22 }
 0x222   :  { %v485_v29 = vmax.f32 %v467_v24, 0.0 }
 0x223   :  { %v656_v31 = vpack.c.b16 %v632_v28, %v632_v28  ;;  %v658_v42 = vpack.c.b16 %v633_v38, %v633_v38  ;;  %v660_v48 = vpack.c.b16 %v634_v45, %v634_v45  ;;  %v662_v59 = vpack.c.b16 %v635_v55, %v635_v55 }
 0x225   :  { %v657_v36 = vpack.c.b8 %v656_v31, %v656_v31  ;;  %v663_v0 = vpack.c.b8 %v662_v59, %v662_v59 }
 0x227   :  { %v468_v25 = vpop.f32.mrf.mxu2  ;;  %vm680_vm3 = vnez %v657_v36  ;;  %vm683_vm10 = vnez %v663_v0 }
 0x228   :  { %v469_v26 = vadd.f32 %v1288_v39, %v468_v25  ;;  %v1658_v39 = vld [vmem:[%s1843_s9] ss:$0 sm:$0xff]  ;;  %v694_v25 = vsel %vm678_vm15, 16843009, %v1436_v27  ;;  %v699_v8 = vsel %vm683_vm10, 16843009, %v1436_v27 }
 0x22a   :  { %v486_v30 = vmax.f32 %v469_v26, 0.0  ;;  %v655_v26 = vpack.c.b8 %v654_v21, %v654_v21 }
 0x22c   :  { %v494_v32 = vpack.c.bf16 %v486_v30, %v485_v29  ;;  %v710_v30 = vunpack.c.0.s8 %v694_v25  ;;  %vm679_vm1 = vnez %v655_v26 }
 0x22d   :  { %v695_v34 = vsel %vm679_vm1, 16843009, %v1436_v27 }
 0x22e   :  { %606 = vmatmul.bf16.gmra.mxu3 %v494_v32  ;;  %vm726_vm2 = vcmp.ne.s32.totalorder %v710_v30, 0  ;;  %v711_v41 = vunpack.c.0.s8 %v695_v34 }
 0x241   :  { %v572_v44 = vpop.f32.mrf.mxu3 }
 0x242   :  { %v573_v37 = vadd.f32 %v1658_v39, %v572_v44  ;;  %v696_v44 = vsel %vm680_vm3, 16843009, %v1436_v27 }
 0x243   :  { %v712_v47 = vunpack.c.0.s8 %v696_v44 }
 0x244   :  { %v1665_v49 = vsel %vm720_vm4, %v573_v37, -1e+30  ;;  %vm727_vm4 = vcmp.ne.s32.totalorder %v711_v41, 0  ;;  %v659_v37 = vpack.c.b8 %v658_v42, %v658_v42 }
 0x245   :  { %752 = vmax.xlane.f32.xlu0 %v1665_v49  ;;  %vm728_vm6 = vcmp.ne.s32.totalorder %v712_v47, 0 }
 0x246   :  { %vm681_vm5 = vnez %v659_v37 }
 0x247   :  { %v697_v52 = vsel %vm681_vm5, 16843009, %v1436_v27 }
 0x248   :  { %v713_v57 = vunpack.c.0.s8 %v697_v52 }
 0x249   :  { %v574_v53 = vpop.f32.mrf.mxu3 }
 0x24a   :  { %v575_v54 = vadd.f32 %v1658_v39, %v574_v53  ;;  %v615_v53 = vld [vmem:[%s1835_s1 + $0x18] sm:$0xff]  ;;  %s1437_s1 = smov [#allocation7]  }
 0x24b   :  { %s1124_s3 = sshll.u32 %s1437_s1, 4  ;;  %s1125_s3 = int_to_ptr.vmem [resolvable:$true] %s1124_s3 }
 0x24c   :  { %v1671_v58 = vsel %vm721_vm7, %v575_v54, -1e+30  ;;  %v661_v54 = vpack.c.b8 %v660_v48, %v660_v48  ;;  %vm619_vm7 = vnez %v615_v53 }
 0x24d   :  { %754 = vmax.xlane.f32.xlu0 %v1671_v58  ;;  %v623_v60 = vsel %vm619_vm7, 16843009, %v1436_v27 }
 0x24e   :  { %vm682_vm8 = vnez %v661_v54  ;;  %v636_v1 = vunpack.c.0.s8 %v623_v60  ;;  %v637_v11 = vunpack.c.1.s8 %v623_v60  ;;  %v638_v20 = vunpack.c.2.s8 %v623_v60 }
 0x24f   :  { %v698_v63 = vsel %vm682_vm8, 16843009, %v1436_v27  ;;  %v639_v30 = vunpack.c.3.s8 %v623_v60 }
 0x250   :  { %v714_v4 = vunpack.c.0.s8 %v698_v63 }
 0x251   :  { %v577_v61 = vpop.f32.mrf.mxu3 }
 0x252   :  { %v578_v62 = vadd.f32 %v1658_v39, %v577_v61 }
 0x254   :  { %v1676_v2 = vsel %vm722_vm9, %v578_v62, -1e+30  ;;  %vm729_vm9 = vcmp.ne.s32.totalorder %v713_v57, 0 }
 0x255   :  { %756 = vmax.xlane.f32.xlu1 %v1676_v2 }
 0x259   :  { %v579_v5 = vpop.f32.mrf.mxu3 }
 0x25a   :  { %v580_v6 = vadd.f32 %v1658_v39, %v579_v5  ;;  %v664_v5 = vpack.c.b16 %v636_v1, %v636_v1 }
 0x25c   :  { %v1681_v10 = vsel %vm723_vm11, %v580_v6, -1e+30  ;;  %vm730_vm11 = vcmp.ne.s32.totalorder %v714_v4, 0  ;;  %v665_v9 = vpack.c.b8 %v664_v5, %v664_v5 }
 0x25d   :  { %758 = vmax.xlane.f32.xlu1 %v1681_v10 }
 0x25e   :  { %vm684_vm12 = vnez %v665_v9 }
 0x25f   :  { %v700_v17 = vsel %vm684_vm12, 16843009, %v1436_v27 }
 0x260   :  { %v716_v22 = vunpack.c.0.s8 %v700_v17 }
 0x261   :  { %v582_v13 = vpop.f32.mrf.mxu3 }
 0x262   :  { %v583_v14 = vadd.f32 %v1658_v39, %v582_v13  ;;  %v715_v13 = vunpack.c.0.s8 %v699_v8  ;;  %vm732_vm15 = vcmp.ne.s32.totalorder %v716_v22, 0 }
 0x264   :  { %v1689_v19 = vsel %vm724_vm13, %v583_v14, -1e+30  ;;  %v666_v14 = vpack.c.b16 %v637_v11, %v637_v11  ;;  %vm731_vm13 = vcmp.ne.s32.totalorder %v715_v13, 0 }
 0x265   :  { %760 = vmax.xlane.f32.xlu2 %v1689_v19 }
 0x266   :  { %v667_v18 = vpack.c.b8 %v666_v14, %v666_v14 }
 0x268   :  { %vm685_vm14 = vnez %v667_v18 }
 0x269   :  { %v584_v23 = vpop.f32.mrf.mxu3  ;;  %v701_v26 = vsel %vm685_vm14, 16843009, %v1436_v27 }
 0x26a   :  { %v585_v24 = vadd.f32 %v1658_v39, %v584_v23  ;;  %v668_v23 = vpack.c.b16 %v638_v20, %v638_v20 }
 0x26c   :  { %v1695_v29 = vsel %vm725_vm0, %v585_v24, -1e+30  ;;  %v669_v28 = vpack.c.b8 %v668_v23, %v668_v23 }
 0x26d   :  { %762 = vmax.xlane.f32.xlu2 %v1695_v29 }
 0x26e   :  { %vm686_vm0 = vnez %v669_v28 }
 0x26f   :  { %v702_v38 = vsel %vm686_vm0, 16843009, %v1436_v27 }
 0x271   :  { %v587_v32 = vpop.f32.mrf.mxu3 }
 0x272   :  { %v588_v33 = vadd.f32 %v1658_v39, %v587_v32  ;;  %v717_v32 = vunpack.c.0.s8 %v701_v26 }
 0x274   :  { %v1700_v40 = vsel %vm726_vm2, %v588_v33, -1e+30  ;;  %v670_v33 = vpack.c.b16 %v639_v30, %v639_v30  ;;  %vm733_vm1 = vcmp.ne.s32.totalorder %v717_v32, 0 }
 0x275   :  { %764 = vmax.xlane.f32.xlu0 %v1700_v40 }
 0x276   :  { %v671_v41 = vpack.c.b8 %v670_v33, %v670_v33 }
 0x278   :  { %vm687_vm2 = vnez %v671_v41 }
 0x279   :  { %v589_v43 = vpop.f32.mrf.mxu3  ;;  %v703_v37 = vsel %vm687_vm2, 16843009, %v1436_v27 }
 0x27a   :  { %v590_v35 = vadd.f32 %v1658_v39, %v589_v43  ;;  %v718_v43 = vunpack.c.0.s8 %v702_v38  ;;  %v719_v47 = vunpack.c.0.s8 %v703_v37 }
 0x27c   :  { %v1705_v46 = vsel %vm727_vm4, %v590_v35, -1e+30  ;;  %vm734_vm3 = vcmp.ne.s32.totalorder %v718_v43, 0  ;;  %vm735_vm4 = vcmp.ne.s32.totalorder %v719_v47, 0 }
 0x27d   :  { %766 = vmax.xlane.f32.xlu1 %v1705_v46 }
 0x281   :  { %v592_v50 = vpop.f32.mrf.mxu3 }
 0x282   :  { %v593_v51 = vadd.f32 %v1658_v39, %v592_v50 }
 0x284   :  { %v1713_v56 = vsel %vm728_vm6, %v593_v51, -1e+30 }
 0x285   :  { %768 = vmax.xlane.f32.xlu2 %v1713_v56 }
 0x289   :  { %v594_v61 = vpop.f32.mrf.mxu3 }
 0x28a   :  { %v595_v62 = vadd.f32 %v1658_v39, %v594_v61 }
 0x28c   :  { %v1719_v3 = vsel %vm729_vm9, %v595_v62, -1e+30 }
 0x28d   :  { %770 = vmax.xlane.f32.xlu0 %v1719_v3 }
 0x291   :  { %v597_v6 = vpop.f32.mrf.mxu3 }
 0x292   :  { %v598_v7 = vadd.f32 %v1658_v39, %v597_v6 }
 0x294   :  { %v1724_v12 = vsel %vm730_vm11, %v598_v7, -1e+30 }
 0x295   :  { %772 = vmax.xlane.f32.xlu1 %v1724_v12 }
 0x299   :  { %v599_v15 = vpop.f32.mrf.mxu3 }
 0x29a   :  { %v600_v16 = vadd.f32 %v1658_v39, %v599_v15 }
 0x29c   :  { %v1729_v21 = vsel %vm731_vm13, %v600_v16, -1e+30 }
 0x29d   :  { %774 = vmax.xlane.f32.xlu2 %v1729_v21 }
 0x2a1   :  { %v602_v24 = vpop.f32.mrf.mxu3 }
 0x2a2   :  { %v603_v25 = vadd.f32 %v1658_v39, %v602_v24 }
 0x2a4   :  { %v1734_v31 = vsel %vm732_vm15, %v603_v25, -1e+30 }
 0x2a5   :  { %776 = vmax.xlane.f32.xlu0 %v1734_v31 }
 0x2a9   :  { %v604_v34 = vpop.f32.mrf.mxu3 }
 0x2aa   :  { %v605_v36 = vadd.f32 %v1658_v39, %v604_v34 }
 0x2ac   :  { %v1739_v42 = vsel %vm733_vm1, %v605_v36, -1e+30 }
 0x2ad   :  { %778 = vmax.xlane.f32.xlu1 %v1739_v42 }
 0x2b1   :  { %v607_v35 = vpop.f32.mrf.mxu3 }
 0x2b2   :  { %v608_v44 = vadd.f32 %v1658_v39, %v607_v35 }
 0x2b4   :  { %v1744_v45 = vsel %vm734_vm3, %v608_v44, -1e+30 }
 0x2b5   :  { %780 = vmax.xlane.f32.xlu2 %v1744_v45 }
 0x2b8   :  { %v753_v48 = vpop.xlane.xlu0 %752 }
 0x2b9   :  { %v784_v50 = vsub.f32 %v1665_v49, %v753_v48  ;;  %v609_v51 = vpop.f32.mrf.mxu3 }
 0x2ba   :  { %v610_v52 = vadd.f32 %v1658_v39, %v609_v51 }
 0x2bb   :  { %v800_v53 = vmul.f32 1.442695, %v784_v50 }
 0x2bc   :  { %v1749_v54 = vsel %vm735_vm4, %v610_v52, -1e+30 }
 0x2bd   :  { %1290 = vpow2.f32 %v800_v53  ;;  %782 = vmax.xlane.f32.xlu0 %v1749_v54 }
 0x2c0   :  { %v755_v55 = vpop.xlane.xlu0 %754 }
 0x2c1   :  { %v785_v27 = vsub.f32 %v1671_v58, %v755_v55 }
 0x2c3   :  { %v1753_v57 = vpop.eup %1290  ;;  %v802_v59 = vmul.f32 1.442695, %v785_v27 }
 0x2c4   :  { %832 = vadd.xlane.f32.xlu1 %v1753_v57 }
 0x2c5   :  { %1292 = vpow2.f32 %v802_v59 }
 0x2c8   :  { %v757_v49 = vpop.xlane.xlu1 %756 }
 0x2c9   :  { %v786_v60 = vsub.f32 %v1676_v2, %v757_v49 }
 0x2cb   :  { %v1757_v61 = vpop.eup %1292  ;;  %v804_v39 = vmul.f32 1.442695, %v786_v60 }
 0x2cc   :  { %834 = vadd.xlane.f32.xlu2 %v1757_v61 }
 0x2cd   :  { %1294 = vpow2.f32 %v804_v39 }
 0x2d0   :  { %v759_v62 = vpop.xlane.xlu1 %758 }
 0x2d1   :  { %v787_v63 = vsub.f32 %v1681_v10, %v759_v62 }
 0x2d3   :  { %v1761_v0 = vpop.eup %1294  ;;  %v806_v58 = vmul.f32 1.442695, %v787_v63 }
 0x2d4   :  { %836 = vadd.xlane.f32.xlu0 %v1761_v0 }
 0x2d5   :  { %1296 = vpow2.f32 %v806_v58 }
 0x2d8   :  { %v761_v1 = vpop.xlane.xlu2 %760 }
 0x2d9   :  { %v788_v4 = vsub.f32 %v1689_v19, %v761_v1 }
 0x2db   :  { %v1765_v5 = vpop.eup %1296  ;;  %v808_v2 = vmul.f32 1.442695, %v788_v4 }
 0x2dc   :  { %838 = vadd.xlane.f32.xlu1 %v1765_v5 }
 0x2dd   :  { %1298 = vpow2.f32 %v808_v2 }
 0x2e0   :  { %v763_v6 = vpop.xlane.xlu2 %762 }
 0x2e1   :  { %v789_v7 = vsub.f32 %v1695_v29, %v763_v6 }
 0x2e3   :  { %v1769_v8 = vpop.eup %1298  ;;  %v810_v10 = vmul.f32 1.442695, %v789_v7 }
 0x2e4   :  { %840 = vadd.xlane.f32.xlu2 %v1769_v8 }
 0x2e5   :  { %1300 = vpow2.f32 %v810_v10 }
 0x2e8   :  { %v765_v9 = vpop.xlane.xlu0 %764 }
 0x2e9   :  { %v790_v11 = vsub.f32 %v1700_v40, %v765_v9 }
 0x2eb   :  { %v1773_v13 = vpop.eup %1300  ;;  %v812_v19 = vmul.f32 1.442695, %v790_v11 }
 0x2ec   :  { %842 = vadd.xlane.f32.xlu0 %v1773_v13 }
 0x2ed   :  { %1302 = vpow2.f32 %v812_v19 }
 0x2f0   :  { %v767_v14 = vpop.xlane.xlu1 %766 }
 0x2f1   :  { %v791_v15 = vsub.f32 %v1705_v46, %v767_v14 }
 0x2f3   :  { %v1777_v16 = vpop.eup %1302  ;;  %v814_v29 = vmul.f32 1.442695, %v791_v15 }
 0x2f4   :  { %844 = vadd.xlane.f32.xlu1 %v1777_v16 }
 0x2f5   :  { %1304 = vpow2.f32 %v814_v29 }
 0x2f8   :  { %v769_v17 = vpop.xlane.xlu2 %768 }
 0x2f9   :  { %v792_v18 = vsub.f32 %v1713_v56, %v769_v17 }
 0x2fb   :  { %v1781_v20 = vpop.eup %1304  ;;  %v816_v40 = vmul.f32 1.442695, %v792_v18 }
 0x2fc   :  { %846 = vadd.xlane.f32.xlu2 %v1781_v20 }
 0x2fd   :  { %1306 = vpow2.f32 %v816_v40 }
 0x300   :  { %v771_v22 = vpop.xlane.xlu0 %770 }
 0x301   :  { %v793_v23 = vsub.f32 %v1719_v3, %v771_v22 }
 0x303   :  { %v1785_v24 = vpop.eup %1306  ;;  %v818_v46 = vmul.f32 1.442695, %v793_v23 }
 0x304   :  { %848 = vadd.xlane.f32.xlu0 %v1785_v24 }
 0x305   :  { %1308 = vpow2.f32 %v818_v46 }
 0x308   :  { %v773_v25 = vpop.xlane.xlu1 %772 }
 0x309   :  { %v794_v26 = vsub.f32 %v1724_v12, %v773_v25 }
 0x30b   :  { %v1789_v28 = vpop.eup %1308  ;;  %v820_v56 = vmul.f32 1.442695, %v794_v26 }
 0x30c   :  { %850 = vadd.xlane.f32.xlu1 %v1789_v28 }
 0x30d   :  { %1310 = vpow2.f32 %v820_v56 }
 0x310   :  { %v775_v30 = vpop.xlane.xlu2 %774 }
 0x311   :  { %v795_v32 = vsub.f32 %v1729_v21, %v775_v30 }
 0x313   :  { %v1793_v33 = vpop.eup %1310  ;;  %v822_v3 = vmul.f32 1.442695, %v795_v32 }
 0x314   :  { %852 = vadd.xlane.f32.xlu2 %v1793_v33 }
 0x315   :  { %1312 = vpow2.f32 %v822_v3 }
 0x318   :  { %v777_v34 = vpop.xlane.xlu0 %776 }
 0x319   :  { %v796_v36 = vsub.f32 %v1734_v31, %v777_v34 }
 0x31b   :  { %v1797_v38 = vpop.eup %1312  ;;  %v824_v12 = vmul.f32 1.442695, %v796_v36 }
 0x31c   :  { %854 = vadd.xlane.f32.xlu0 %v1797_v38 }
 0x31d   :  { %1314 = vpow2.f32 %v824_v12 }
 0x320   :  { %v779_v41 = vpop.xlane.xlu1 %778 }
 0x321   :  { %v797_v43 = vsub.f32 %v1739_v42, %v779_v41 }
 0x323   :  { %v1801_v35 = vpop.eup %1314  ;;  %v826_v21 = vmul.f32 1.442695, %v797_v43 }
 0x324   :  { %856 = vadd.xlane.f32.xlu1 %v1801_v35 }
 0x325   :  { %1316 = vpow2.f32 %v826_v21 }
 0x328   :  { %v781_v44 = vpop.xlane.xlu2 %780 }
 0x329   :  { %v798_v37 = vsub.f32 %v1744_v45, %v781_v44 }
 0x32b   :  { %v1805_v47 = vpop.eup %1316  ;;  %v828_v31 = vmul.f32 1.442695, %v798_v37 }
 0x32c   :  { %858 = vadd.xlane.f32.xlu2 %v1805_v47 }
 0x32d   :  { %1318 = vpow2.f32 %v828_v31 }
 0x330   :  { %v783_v48 = vpop.xlane.xlu0 %782 }
 0x331   :  { %v799_v50 = vsub.f32 %v1749_v54, %v783_v48 }
 0x333   :  { %v1809_v51 = vpop.eup %1318  ;;  %v830_v42 = vmul.f32 1.442695, %v799_v50 }
 0x334   :  { %860 = vadd.xlane.f32.xlu0 %v1809_v51 }
 0x335   :  { %1320 = vpow2.f32 %v830_v42 }
 0x337   :  { %v833_v52 = vpop.xlane.xlu1 %832 }
 0x338   :  { %1322 = vrcp.f32 %v833_v52  ;;  %v875_v49 = vand.u32 2147483648, %v833_v52  ;;  %v873_v54 = vand.u32 2147483647, %v833_v52  ;;  %vm869_vm6 = vweird.f32 %v833_v52 }
 0x33a   :  { %v876_v63 = vor.u32 1.1754944e-38, %v875_v49  ;;  %vm874_vm8 = vcmp.eq.f32.partialorder %v873_v54, 8.507059e+37 }
 0x33b   :  { %v1812_v53 = vpop.eup %1320 }
 0x33c   :  { %862 = vadd.xlane.f32.xlu1 %v1812_v53 }
 0x33e   :  { %v1323_v45 = vpop.eup %1322 }
 0x33f   :  { %v865_v55 = vmul.f32 %v1323_v45, %v833_v52  ;;  %v835_v27 = vpop.xlane.xlu2 %834  ;;  %vm870_vm5 = vweird.f32 %v1323_v45 }
 0x340   :  { %1324 = vrcp.f32 %v835_v27  ;;  %vm871_vm7 = vmor %vm869_vm6, %vm870_vm5  ;;  %v890_v10 = vand.u32 2147483648, %v835_v27  ;;  %v888_v11 = vand.u32 2147483647, %v835_v27  ;;  %vm884_vm10 = vweird.f32 %v835_v27 }
 0x341   :  { %v866_v59 = vsub.f32 1.0, %v865_v55 }
 0x342   :  { %v891_v15 = vor.u32 1.1754944e-38, %v890_v10  ;;  %vm889_vm12 = vcmp.eq.f32.partialorder %v888_v11, 8.507059e+37 }
 0x343   :  { %v867_v60 = vmul.f32 %v1323_v45, %v866_v59 }
 0x345   :  { %v868_v39 = vadd.f32 %v1323_v45, %v867_v60 }
 0x346   :  { %v1325_v62 = vpop.eup %1324 }
 0x347   :  { %v872_v58 = vsel %vm871_vm7, %v1323_v45, %v868_v39  ;;  %v880_v1 = vmul.f32 %v1325_v62, %v835_v27  ;;  %v837_v4 = vpop.xlane.xlu0 %836  ;;  %vm885_vm9 = vweird.f32 %v1325_v62 }
 0x348   :  { %v877_v2 = vsel %vm874_vm8, %v876_v63, %v872_v58  ;;  %1326 = vrcp.f32 %v837_v4  ;;  %vm886_vm11 = vmor %vm884_vm10, %vm885_vm9  ;;  %v905_v23 = vand.u32 2147483648, %v837_v4  ;;  %v903_v25 = vand.u32 2147483647, %v837_v4 }
 0x349   :  { %v878_v6 = vmul.f32 %v1753_v57, %v877_v2  ;;  %v881_v7 = vsub.f32 1.0, %v880_v1  ;;  %vm899_vm14 = vweird.f32 %v837_v4 }
 0x34a   :  { %v906_v30 = vor.u32 1.1754944e-38, %v905_v23  ;;  %vm904_vm0 = vcmp.eq.f32.partialorder %v903_v25, 8.507059e+37 }
 0x34b   :  { %1104 = vst [vmem:[#allocation7] sm:$0xff] %v878_v6  ;;  %v882_v9 = vmul.f32 %v1325_v62, %v881_v7 }
 0x34d   :  { %v883_v19 = vadd.f32 %v1325_v62, %v882_v9 }
 0x34e   :  { %v1327_v14 = vpop.eup %1326 }
 0x34f   :  { %v887_v29 = vsel %vm886_vm11, %v1325_v62, %v883_v19  ;;  %v895_v17 = vmul.f32 %v1327_v14, %v837_v4  ;;  %v839_v18 = vpop.xlane.xlu1 %838  ;;  %vm900_vm13 = vweird.f32 %v1327_v14 }
 0x350   :  { %v892_v40 = vsel %vm889_vm12, %v891_v15, %v887_v29  ;;  %1328 = vrcp.f32 %v839_v18  ;;  %vm901_vm15 = vmor %vm899_vm14, %vm900_vm13  ;;  %v920_v41 = vand.u32 2147483648, %v839_v18  ;;  %v918_v21 = vand.u32 2147483647, %v839_v18 }
 0x351   :  { %v893_v22 = vmul.f32 %v1757_v61, %v892_v40  ;;  %v896_v57 = vsub.f32 1.0, %v895_v17  ;;  %vm914_vm2 = vweird.f32 %v839_v18 }
 0x352   :  { %v921_v31 = vor.u32 1.1754944e-38, %v920_v41  ;;  %vm919_vm4 = vcmp.eq.f32.partialorder %v918_v21, 8.507059e+37 }
 0x353   :  { %1105 = vst [vmem:[#allocation7 + $0x8] sm:$0xff] %v893_v22  ;;  %v897_v46 = vmul.f32 %v1327_v14, %v896_v57 }
 0x355   :  { %v898_v26 = vadd.f32 %v1327_v14, %v897_v46 }
 0x356   :  { %v1329_v56 = vpop.eup %1328 }
 0x357   :  { %v902_v32 = vsel %vm901_vm15, %v1327_v14, %v898_v26  ;;  %v910_v3 = vmul.f32 %v1329_v56, %v839_v18  ;;  %v841_v34 = vpop.xlane.xlu2 %840  ;;  %vm915_vm1 = vweird.f32 %v1329_v56 }
 0x358   :  { %v907_v36 = vsel %vm904_vm0, %v906_v30, %v902_v32  ;;  %1330 = vrcp.f32 %v841_v34  ;;  %vm916_vm3 = vmor %vm914_vm2, %vm915_vm1  ;;  %v935_v55 = vand.u32 2147483648, %v841_v34  ;;  %v933_v59 = vand.u32 2147483647, %v841_v34 }
 0x359   :  { %v908_v12 = vmul.f32 %v1761_v0, %v907_v36  ;;  %v911_v61 = vsub.f32 1.0, %v910_v3  ;;  %vm929_vm6 = vweird.f32 %v841_v34 }
 0x35a   :  { %v936_v54 = vor.u32 1.1754944e-38, %v935_v55  ;;  %vm934_vm8 = vcmp.eq.f32.partialorder %v933_v59, 8.507059e+37 }
 0x35b   :  { %1106 = vst [vmem:[#allocation7 + $0x10] sm:$0xff] %v908_v12  ;;  %v912_v43 = vmul.f32 %v1329_v56, %v911_v61 }
 0x35d   :  { %v913_v44 = vadd.f32 %v1329_v56, %v912_v43 }
 0x35e   :  { %v1331_v37 = vpop.eup %1330 }
 0x35f   :  { %v917_v48 = vsel %vm916_vm3, %v1329_v56, %v913_v44  ;;  %v925_v50 = vmul.f32 %v1331_v37, %v841_v34  ;;  %v843_v42 = vpop.xlane.xlu0 %842  ;;  %vm930_vm5 = vweird.f32 %v1331_v37 }
 0x360   :  { %v922_v52 = vsel %vm919_vm4, %v921_v31, %v917_v48  ;;  %1332 = vrcp.f32 %v843_v42  ;;  %vm931_vm7 = vmor %vm929_vm6, %vm930_vm5  ;;  %v950_v4 = vand.u32 2147483648, %v843_v42  ;;  %v948_v6 = vand.u32 2147483647, %v843_v42 }
 0x361   :  { %v923_v45 = vmul.f32 %v1765_v5, %v922_v52  ;;  %v926_v0 = vsub.f32 1.0, %v925_v50  ;;  %vm944_vm10 = vweird.f32 %v843_v42 }
 0x362   :  { %v951_v9 = vor.u32 1.1754944e-38, %v950_v4  ;;  %vm949_vm12 = vcmp.eq.f32.partialorder %v948_v6, 8.507059e+37 }
 0x363   :  { %1107 = vst [vmem:[#allocation7 + $0x18] sm:$0xff] %v923_v45  ;;  %v927_v27 = vmul.f32 %v1331_v37, %v926_v0 }
 0x365   :  { %v928_v49 = vadd.f32 %v1331_v37, %v927_v27 }
 0x366   :  { %v1333_v60 = vpop.eup %1332 }
 0x367   :  { %v932_v39 = vsel %vm931_vm7, %v1331_v37, %v928_v49  ;;  %v940_v62 = vmul.f32 %v1333_v60, %v843_v42  ;;  %v845_v63 = vpop.xlane.xlu1 %844  ;;  %vm945_vm9 = vweird.f32 %v1333_v60 }
 0x368   :  { %v937_v58 = vsel %vm934_vm8, %v936_v54, %v932_v39  ;;  %1334 = vrcp.f32 %v845_v63  ;;  %vm946_vm11 = vmor %vm944_vm10, %vm945_vm9  ;;  %v965_v17 = vand.u32 2147483648, %v845_v63  ;;  %v963_v40 = vand.u32 2147483647, %v845_v63 }
 0x369   :  { %v938_v1 = vmul.f32 %v1769_v8, %v937_v58  ;;  %v941_v5 = vsub.f32 1.0, %v940_v62  ;;  %vm959_vm14 = vweird.f32 %v845_v63 }
 0x36a   :  { %v966_v23 = vor.u32 1.1754944e-38, %v965_v17  ;;  %vm964_vm0 = vcmp.eq.f32.partialorder %v963_v40, 8.507059e+37 }
 0x36b   :  { %1108 = vst [vmem:[#allocation7 + $0x20] sm:$0xff] %v938_v1  ;;  %v942_v2 = vmul.f32 %v1333_v60, %v941_v5 }
 0x36d   :  { %v943_v7 = vadd.f32 %v1333_v60, %v942_v2 }
 0x36e   :  { %v1335_v10 = vpop.eup %1334 }
 0x36f   :  { %v947_v11 = vsel %vm946_vm11, %v1333_v60, %v943_v7  ;;  %v955_v19 = vmul.f32 %v1335_v10, %v845_v63  ;;  %v847_v14 = vpop.xlane.xlu2 %846  ;;  %vm960_vm13 = vweird.f32 %v1335_v10 }
 0x370   :  { %v952_v15 = vsel %vm949_vm12, %v951_v9, %v947_v11  ;;  %1336 = vrcp.f32 %v847_v14  ;;  %vm961_vm15 = vmor %vm959_vm14, %vm960_vm13  ;;  %v980_v32 = vand.u32 2147483648, %v847_v14  ;;  %v978_v34 = vand.u32 2147483647, %v847_v14 }
 0x371   :  { %v953_v29 = vmul.f32 %v1773_v13, %v952_v15  ;;  %v956_v8 = vsub.f32 1.0, %v955_v19  ;;  %vm974_vm2 = vweird.f32 %v847_v14 }
 0x372   :  { %v981_v61 = vor.u32 1.1754944e-38, %v980_v32  ;;  %vm979_vm4 = vcmp.eq.f32.partialorder %v978_v34, 8.507059e+37 }
 0x373   :  { %1109 = vst [vmem:[#allocation7 + $0x28] sm:$0xff] %v953_v29  ;;  %v957_v18 = vmul.f32 %v1335_v10, %v956_v8 }
 0x375   :  { %v958_v22 = vadd.f32 %v1335_v10, %v957_v18 }
 0x376   :  { %v1337_v57 = vpop.eup %1336 }
 0x377   :  { %v962_v46 = vsel %vm961_vm15, %v1335_v10, %v958_v22  ;;  %v970_v25 = vmul.f32 %v1337_v57, %v847_v14  ;;  %v849_v26 = vpop.xlane.xlu0 %848  ;;  %vm975_vm1 = vweird.f32 %v1337_v57 }
 0x378   :  { %v967_v56 = vsel %vm964_vm0, %v966_v23, %v962_v46  ;;  %1338 = vrcp.f32 %v849_v26  ;;  %vm976_vm3 = vmor %vm974_vm2, %vm975_vm1  ;;  %v995_v31 = vand.u32 2147483648, %v849_v26  ;;  %v993_v50 = vand.u32 2147483647, %v849_v26 }
 0x379   :  { %v968_v30 = vmul.f32 %v1777_v16, %v967_v56  ;;  %v971_v13 = vsub.f32 1.0, %v970_v25  ;;  %vm989_vm6 = vweird.f32 %v849_v26 }
 0x37a   :  { %v996_v45 = vor.u32 1.1754944e-38, %v995_v31  ;;  %vm994_vm8 = vcmp.eq.f32.partialorder %v993_v50, 8.507059e+37 }
 0x37b   :  { %1110 = vst [vmem:[#allocation7 + $0x30] sm:$0xff] %v968_v30  ;;  %v972_v3 = vmul.f32 %v1337_v57, %v971_v13 }
 0x37d   :  { %v973_v36 = vadd.f32 %v1337_v57, %v972_v3 }
 0x37e   :  { %v1339_v12 = vpop.eup %1338 }
 0x37f   :  { %v977_v41 = vsel %vm976_vm3, %v1337_v57, %v973_v36  ;;  %v985_v43 = vmul.f32 %v1339_v12, %v849_v26  ;;  %v851_v21 = vpop.xlane.xlu1 %850  ;;  %vm990_vm5 = vweird.f32 %v1339_v12 }
 0x380   :  { %v982_v44 = vsel %vm979_vm4, %v981_v61, %v977_v41  ;;  %1340 = vrcp.f32 %v851_v21  ;;  %vm991_vm7 = vmor %vm989_vm6, %vm990_vm5  ;;  %v1010_v60 = vand.u32 2147483648, %v851_v21  ;;  %v1008_v39 = vand.u32 2147483647, %v851_v21 }
 0x381   :  { %v983_v37 = vmul.f32 %v1781_v20, %v982_v44  ;;  %v986_v16 = vsub.f32 1.0, %v985_v43  ;;  %vm1004_vm10 = vweird.f32 %v851_v21 }
 0x382   :  { %v1011_v58 = vor.u32 1.1754944e-38, %v1010_v60  ;;  %vm1009_vm12 = vcmp.eq.f32.partialorder %v1008_v39, 8.507059e+37 }
 0x383   :  { %1111 = vst [vmem:[#allocation7 + $0x38] sm:$0xff] %v983_v37  ;;  %v987_v48 = vmul.f32 %v1339_v12, %v986_v16 }
 0x385   :  { %v988_v42 = vadd.f32 %v1339_v12, %v987_v48 }
 0x386   :  { %v1341_v52 = vpop.eup %1340 }
 0x387   :  { %v992_v0 = vsel %vm991_vm7, %v1339_v12, %v988_v42  ;;  %v1000_v55 = vmul.f32 %v1341_v52, %v851_v21  ;;  %v853_v27 = vpop.xlane.xlu2 %852  ;;  %vm1005_vm9 = vweird.f32 %v1341_v52 }
 0x388   :  { %v997_v59 = vsel %vm994_vm8, %v996_v45, %v992_v0  ;;  %1342 = vrcp.f32 %v853_v27  ;;  %vm1006_vm11 = vmor %vm1004_vm10, %vm1005_vm9  ;;  %v1025_v7 = vand.u32 2147483648, %v853_v27  ;;  %v1023_v9 = vand.u32 2147483647, %v853_v27 }
 0x389   :  { %v998_v49 = vmul.f32 %v1785_v24, %v997_v59  ;;  %v1001_v20 = vsub.f32 1.0, %v1000_v55  ;;  %vm1019_vm14 = vweird.f32 %v853_v27 }
 0x38a   :  { %v1026_v14 = vor.u32 1.1754944e-38, %v1025_v7  ;;  %vm1024_vm0 = vcmp.eq.f32.partialorder %v1023_v9, 8.507059e+37 }
 0x38b   :  { %1112 = vst [vmem:[#allocation7 + $0x40] sm:$0xff] %v998_v49  ;;  %v1002_v54 = vmul.f32 %v1341_v52, %v1001_v20 }
 0x38d   :  { %v1003_v62 = vadd.f32 %v1341_v52, %v1002_v54 }
 0x38e   :  { %v1343_v63 = vpop.eup %1342 }
 0x38f   :  { %v1007_v1 = vsel %vm1006_vm11, %v1341_v52, %v1003_v62  ;;  %v1015_v5 = vmul.f32 %v1343_v63, %v853_v27  ;;  %v855_v4 = vpop.xlane.xlu0 %854  ;;  %vm1020_vm13 = vweird.f32 %v1343_v63 }
 0x390   :  { %v1012_v2 = vsel %vm1009_vm12, %v1011_v58, %v1007_v1  ;;  %1344 = vrcp.f32 %v855_v4  ;;  %vm1021_vm15 = vmor %vm1019_vm14, %vm1020_vm13  ;;  %v1040_v40 = vand.u32 2147483648, %v855_v4  ;;  %v1038_v57 = vand.u32 2147483647, %v855_v4 }
 0x391   :  { %v1013_v6 = vmul.f32 %v1789_v28, %v1012_v2  ;;  %v1016_v24 = vsub.f32 1.0, %v1015_v5  ;;  %vm1034_vm2 = vweird.f32 %v855_v4 }
 0x392   :  { %v1041_v25 = vor.u32 1.1754944e-38, %v1040_v40  ;;  %vm1039_vm4 = vcmp.eq.f32.partialorder %v1038_v57, 8.507059e+37 }
 0x393   :  { %1113 = vst [vmem:[#allocation7 + $0x48] sm:$0xff] %v1013_v6  ;;  %v1017_v10 = vmul.f32 %v1343_v63, %v1016_v24 }
 0x395   :  { %v1018_v11 = vadd.f32 %v1343_v63, %v1017_v10 }
 0x396   :  { %v1345_v19 = vpop.eup %1344 }
 0x397   :  { %v1022_v15 = vsel %vm1021_vm15, %v1343_v63, %v1018_v11  ;;  %v1030_v29 = vmul.f32 %v1345_v19, %v855_v4  ;;  %v857_v8 = vpop.xlane.xlu1 %856  ;;  %vm1035_vm1 = vweird.f32 %v1345_v19 }
 0x398   :  { %v1027_v17 = vsel %vm1024_vm0, %v1026_v14, %v1022_v15  ;;  %1346 = vrcp.f32 %v857_v8  ;;  %vm1036_vm3 = vmor %vm1034_vm2, %vm1035_vm1  ;;  %v1055_v3 = vand.u32 2147483648, %v857_v8  ;;  %v1053_v36 = vand.u32 2147483647, %v857_v8 }
 0x399   :  { %v1028_v18 = vmul.f32 %v1793_v33, %v1027_v17  ;;  %v1031_v28 = vsub.f32 1.0, %v1030_v29  ;;  %vm1049_vm6 = vweird.f32 %v857_v8 }
 0x39a   :  { %v1056_v41 = vor.u32 1.1754944e-38, %v1055_v3  ;;  %vm1054_vm8 = vcmp.eq.f32.partialorder %v1053_v36, 8.507059e+37 }
 0x39b   :  { %1114 = vst [vmem:[#allocation7 + $0x50] sm:$0xff] %v1028_v18  ;;  %v1032_v22 = vmul.f32 %v1345_v19, %v1031_v28 }
 0x39d   :  { %v1033_v23 = vadd.f32 %v1345_v19, %v1032_v22 }
 0x39e   :  { %v1347_v46 = vpop.eup %1346 }
 0x39f   :  { %v1037_v26 = vsel %vm1036_vm3, %v1345_v19, %v1033_v23  ;;  %v1045_v56 = vmul.f32 %v1347_v46, %v857_v8  ;;  %v859_v30 = vpop.xlane.xlu2 %858  ;;  %vm1050_vm5 = vweird.f32 %v1347_v46 }
 0x3a0   :  { %v1042_v13 = vsel %vm1039_vm4, %v1041_v25, %v1037_v26  ;;  %1348 = vrcp.f32 %v859_v30  ;;  %vm1051_vm7 = vmor %vm1049_vm6, %vm1050_vm5  ;;  %v1070_v31 = vand.u32 2147483648, %v859_v30  ;;  %v1068_v50 = vand.u32 2147483647, %v859_v30 }
 0x3a1   :  { %v1043_v32 = vmul.f32 %v1797_v38, %v1042_v13  ;;  %v1046_v33 = vsub.f32 1.0, %v1045_v56  ;;  %vm1064_vm10 = vweird.f32 %v859_v30 }
 0x3a2   :  { %v1071_v45 = vor.u32 1.1754944e-38, %v1070_v31  ;;  %vm1069_vm12 = vcmp.eq.f32.partialorder %v1068_v50, 8.507059e+37 }
 0x3a3   :  { %1115 = vst [vmem:[#allocation7 + $0x58] sm:$0xff] %v1043_v32  ;;  %v1047_v34 = vmul.f32 %v1347_v46, %v1046_v33 }
 0x3a5   :  { %v1048_v12 = vadd.f32 %v1347_v46, %v1047_v34 }
 0x3a6   :  { %v1349_v61 = vpop.eup %1348 }
 0x3a7   :  { %v1052_v43 = vsel %vm1051_vm7, %v1347_v46, %v1048_v12  ;;  %v1060_v21 = vmul.f32 %v1349_v61, %v859_v30  ;;  %v861_v44 = vpop.xlane.xlu0 %860  ;;  %vm1065_vm9 = vweird.f32 %v1349_v61 }
 0x3a8   :  { %v1057_v37 = vsel %vm1054_vm8, %v1056_v41, %v1052_v43  ;;  %1350 = vrcp.f32 %v861_v44  ;;  %vm1066_vm11 = vmor %vm1064_vm10, %vm1065_vm9  ;;  %v1085_v20 = vand.u32 2147483648, %v861_v44  ;;  %v1083_v54 = vand.u32 2147483647, %v861_v44 }
 0x3a9   :  { %v1058_v16 = vmul.f32 %v1801_v35, %v1057_v37  ;;  %v1061_v38 = vsub.f32 1.0, %v1060_v21  ;;  %vm1079_vm14 = vweird.f32 %v861_v44 }
 0x3aa   :  { %v1086_v63 = vor.u32 1.1754944e-38, %v1085_v20  ;;  %vm1084_vm0 = vcmp.eq.f32.partialorder %v1083_v54, 8.507059e+37 }
 0x3ab   :  { %1116 = vst [vmem:[#allocation7 + $0x60] sm:$0xff] %v1058_v16  ;;  %v1062_v48 = vmul.f32 %v1349_v61, %v1061_v38 }
 0x3ad   :  { %v1063_v42 = vadd.f32 %v1349_v61, %v1062_v48 }
 0x3ae   :  { %v1351_v52 = vpop.eup %1350 }
 0x3af   :  { %v1067_v0 = vsel %vm1066_vm11, %v1349_v61, %v1063_v42  ;;  %v1075_v55 = vmul.f32 %v1351_v52, %v861_v44  ;;  %v863_v27 = vpop.xlane.xlu1 %862  ;;  %vm1080_vm13 = vweird.f32 %v1351_v52 }
 0x3b0   :  { %v1072_v59 = vsel %vm1069_vm12, %v1071_v45, %v1067_v0  ;;  %1352 = vrcp.f32 %v863_v27  ;;  %vm1081_vm15 = vmor %vm1079_vm14, %vm1080_vm13  ;;  %v1100_v6 = vand.u32 2147483648, %v863_v27  ;;  %v1098_v24 = vand.u32 2147483647, %v863_v27 }
 0x3b1   :  { %v1073_v49 = vmul.f32 %v1805_v47, %v1072_v59  ;;  %v1076_v35 = vsub.f32 1.0, %v1075_v55  ;;  %vm1094_vm2 = vweird.f32 %v863_v27 }
 0x3b2   :  { %v1101_v10 = vor.u32 1.1754944e-38, %v1100_v6  ;;  %vm1099_vm4 = vcmp.eq.f32.partialorder %v1098_v24, 8.507059e+37 }
 0x3b3   :  { %1117 = vst [vmem:[#allocation7 + $0x68] sm:$0xff] %v1073_v49  ;;  %v1077_v60 = vmul.f32 %v1351_v52, %v1076_v35 }
 0x3b5   :  { %v1078_v39 = vadd.f32 %v1351_v52, %v1077_v60 }
 0x3b6   :  { %v1353_v62 = vpop.eup %1352 }
 0x3b7   :  { %v1082_v58 = vsel %vm1081_vm15, %v1351_v52, %v1078_v39  ;;  %v1090_v1 = vmul.f32 %v1353_v62, %v863_v27  ;;  %vm1095_vm1 = vweird.f32 %v1353_v62 }
 0x3b8   :  { %v1087_v5 = vsel %vm1084_vm0, %v1086_v63, %v1082_v58  ;;  %vm1096_vm3 = vmor %vm1094_vm2, %vm1095_vm1 }
 0x3b9   :  { %v1088_v4 = vmul.f32 %v1809_v51, %v1087_v5  ;;  %v1091_v2 = vsub.f32 1.0, %v1090_v1 }
 0x3bb   :  { %1118 = vst [vmem:[#allocation7 + $0x70] sm:$0xff] %v1088_v4  ;;  %v1092_v47 = vmul.f32 %v1353_v62, %v1091_v2 }
 0x3bd   :  { %v1093_v7 = vadd.f32 %v1353_v62, %v1092_v47 }
 0x3bf   :  { %v1097_v9 = vsel %vm1096_vm3, %v1353_v62, %v1093_v7 }
 0x3c0   :  { %v1102_v11 = vsel %vm1099_vm4, %v1101_v10, %v1097_v9 }
 0x3c1   :  { %v1103_v51 = vmul.f32 %v1812_v53, %v1102_v11 }
 0x3c3   :  { %1119 = vst [vmem:[#allocation7 + $0x78] sm:$0xff] %v1103_v51 }
 0x3c4   :  { %1132 = dma.vmem_to_hbm [thread:$0]  %s1125_s3, 2048, %s1127_s30, [#allocation4], %s1438_s11, %s1438_s11, %s1439_s12  }
 0x3c5   :  { %1430 = dma.done.wait [#allocation4], 2048  }
 0x3c6   :  { %1431 = vsyncadd [#allocation4], 4294965248 }
 0x3c7   :  { %1137 = vsyncpa [#allocation3], 1 }
 0x3c8   :  { %1138 = vsyncpa [#allocation6], 1 }
 0x3c9   :  { %1139 = vsyncpa [#allocation4], 1 }

</bundles_post_ra>
